<compile_context>
chip_gen: v7x
topology: tpu7x:2x2x1
jax: 0.10.0
libtpu: 0.0.40
codegen_flags: <defaults>
</compile_context>

<pallas_src>
import numpy as np
import jax
import jax.numpy as jnp
from jax.experimental import pallas as pl
from jax.experimental.pallas import tpu as pltpu

N, C, H, W = 2, 10, 10, 10          # fc expects 1000 = C*H*W  ->  H = W = 10
HW = H * W                          # 100
SP = 128                            # lane-padded spatial size
RP = 32                             # sublane-padded row count (rows = c*N + n)
K9 = 9                              # 3x3 taps
FC_OUT = 100
FP = 128                            # lane-padded fc output
EPS = 1e-5
INV_CNT = 1.0 / float(N * HW)       # BatchNorm divisor (train-mode batch stats)


# -------- structural, parameter-independent constants (built once) --------

def _scat_np():
    """Scat[src, k*SP + dst] = 1 iff output pixel `dst` reads input pixel `src`
    for 3x3 tap k with padding=1.  Folds the spatial shift AND the boundary /
    lane-padding mask of every tap into a single exact 0/1 matrix, so one wide
    MXU matmul produces all 9 shifted+masked input copies."""
    s = np.zeros((SP, K9 * SP), np.float32)
    for k in range(K9):
        dy, dx = k // 3 - 1, k % 3 - 1
        for h in range(H):
            for w in range(W):
                hs, ws = h + dy, w + dx
                if 0 <= hs < H and 0 <= ws < W:
                    s[hs * W + ws, k * SP + h * W + w] = 1.0
    return s


def _pair_np():
    """pair[r, r'] = 1 iff rows r, r' belong to the same channel (row = c*N+n).
    A single tiny matmul both sums the batch rows of a channel and broadcasts
    the per-channel statistic back onto every row."""
    p = np.zeros((RP, RP), np.float32)
    for c in range(C):
        p[c * N:(c + 1) * N, c * N:(c + 1) * N] = 1.0
    return p


_SCAT = jnp.asarray(_scat_np(), jnp.bfloat16)                        # (128, 1152)
_PAIR = jnp.asarray(_pair_np())                                      # (32, 32) f32
_VALID = jnp.asarray((np.arange(SP) < HW).astype(np.float32).reshape(1, SP))


# -------- one-time parameter repacking (hoisted off the per-call path) --------

def pack_params(params):
    (w1, b1, g1, be1, w2, b2, g2, be2, wfc, bfc) = [np.asarray(p, np.float32)
                                                    for p in params]

    def pack_conv(w, b, g, be):
        w9 = w.reshape(C, C, K9)
        wblk = np.zeros((K9, RP, RP), np.float32)      # Kron(w_k, I_N), padded
        for k in range(K9):
            for n in range(N):
                rows = np.arange(C) * N + n
                wblk[k][np.ix_(rows, rows)] = w9[:, :, k]

        def rowvec(v):                                  # per-row (c*N+n) vector
            out = np.zeros((RP, 1), np.float32)
            out[:C * N, 0] = np.repeat(v, N)
            return jnp.asarray(out)

        return (jnp.asarray(wblk.reshape(K9 * RP, RP), jnp.bfloat16),
                rowvec(b), rowvec(g), rowvec(be))

    wblk1, brow1, grow1, berow1 = pack_conv(w1, b1, g1, be1)
    wblk2, brow2, grow2, berow2 = pack_conv(w2, b2, g2, be2)

    # FC weight reordered per channel: wfc2[c*SP + s, f] = wfc[f, c*HW + s]
    wfc2 = np.zeros((C, SP, FP), np.float32)
    wfc2[:, :HW, :FC_OUT] = np.transpose(wfc.reshape(FC_OUT, C, HW), (1, 2, 0))
    wfc2 = jnp.asarray(wfc2.reshape(C * SP, FP), jnp.bfloat16)       # (1280, 128)

    bfcp = np.zeros((1, FP), np.float32)
    bfcp[0, :FC_OUT] = bfc
    return (wblk1, brow1, grow1, berow1,
            wblk2, brow2, grow2, berow2,
            wfc2, jnp.asarray(bfcp))


# ------------------------------- kernel -------------------------------

def net_kernel(x_ref, scat_ref, pair_ref, valid_ref,
               wblk1_ref, brow1_ref, g1_ref, be1_ref,
               wblk2_ref, brow2_ref, g2_ref, be2_ref,
               wfc_hbm_ref, bfc_ref, out_ref,
               wfc_vmem, wfc_sem):
    # Stream the FC weight (largest input) into VMEM while conv/BN runs.
    fc_copy = pltpu.make_async_copy(wfc_hbm_ref, wfc_vmem, wfc_sem)
    fc_copy.start()

    scat = scat_ref[...]            # (128, 1152) bf16, exact 0/1
    pair = pair_ref[...]            # (32, 32)    f32
    valid = valid_ref[...]          # (1, 128)    f32, 1 on the 100 real pixels

    def conv_bn_relu(a_bf, wblk_ref, brow_ref, g_ref, be_ref):
        # All 9 shifted + masked copies of the input with one wide MXU matmul.
        xs = jnp.dot(a_bf, scat, preferred_element_type=jnp.float32)   # (32, 1152)
        xs = xs.astype(jnp.bfloat16)                                    # exact (selection)
        acc = jnp.zeros((RP, SP), jnp.float32)
        for k in range(K9):                                             # 9 tiny channel mixes
            acc = acc + jnp.dot(wblk_ref[k * RP:(k + 1) * RP, :],
                                xs[:, k * SP:(k + 1) * SP],
                                preferred_element_type=jnp.float32)
        y = acc + brow_ref[...] * valid                                 # bias on real pixels only

        # BatchNorm batch statistics (reduce over n, h, w per channel).
        ysum = jnp.sum(jnp.dot(pair, y, preferred_element_type=jnp.float32),
                       axis=1, keepdims=True)                           # (32, 1)
        ysq = jnp.sum(jnp.dot(pair, y * y, preferred_element_type=jnp.float32),
                      axis=1, keepdims=True)                            # (32, 1)
        mean = ysum * INV_CNT
        var = ysq * INV_CNT - mean * mean
        scale = g_ref[...] * jax.lax.rsqrt(var + EPS)
        shift = be_ref[...] - mean * scale
        # Re-mask so lane/row padding stays exactly zero for downstream sums.
        return jnp.maximum(y * scale + shift, 0.0) * valid              # (32, 128) f32

    h1 = conv_bn_relu(x_ref[...], wblk1_ref, brow1_ref, g1_ref, be1_ref)
    h2 = conv_bn_relu(h1.astype(jnp.bfloat16), wblk2_ref, brow2_ref, g2_ref, be2_ref)

    total = jnp.sum(h2, keepdims=True)                                  # (1, 1)
    xd = (h1 * pl.reciprocal(total, approx=False)).astype(jnp.bfloat16)

    fc_copy.wait()
    o = jnp.zeros((N, FP), jnp.float32)
    for c in range(C):                                                  # per-channel FC slices
        o = o + jnp.dot(xd[c * N:(c + 1) * N, :],
                        wfc_vmem[c * SP:(c + 1) * SP, :],
                        preferred_element_type=jnp.float32)
    out_ref[...] = o + bfc_ref[...]                                     # lane-dense (2, 128)


# ------------------------------- wrapper -------------------------------

@jax.jit
def net_forward(x_nchw, packed):
    (wblk1, brow1, grow1, berow1,
     wblk2, brow2, grow2, berow2, wfc2, bfcp) = packed

    # Per-call work: only repack the activations into (c-major rows, spatial lanes).
    x_cm = jnp.transpose(x_nchw.reshape(N, C, HW), (1, 0, 2)).reshape(C * N, HW)
    x_cm = jnp.pad(x_cm, ((0, RP - C * N), (0, SP - HW))).astype(jnp.bfloat16)

    vmem = lambda: pl.BlockSpec(memory_space=pltpu.MemorySpace.VMEM)
    out = pl.pallas_call(
        net_kernel,
        out_shape=jax.ShapeDtypeStruct((N, FP), jnp.float32),
        in_specs=[vmem(),                                  # x
                  vmem(), vmem(), vmem(),                  # scat, pair, valid
                  vmem(), vmem(), vmem(), vmem(),          # conv/bn layer 1
                  vmem(), vmem(), vmem(), vmem(),          # conv/bn layer 2
                  pl.BlockSpec(memory_space=pl.ANY),       # fc weight (manual DMA)
                  vmem()],                                 # fc bias
        out_specs=vmem(),
        scratch_shapes=[pltpu.VMEM((C * SP, FP), jnp.bfloat16),
                        pltpu.SemaphoreType.DMA],
        cost_estimate=pl.CostEstimate(flops=26_000_000, transcendentals=128,
                                      bytes_accessed=700_000),
    )(x_cm, _SCAT, _PAIR, _VALID,
      wblk1, brow1, grow1, berow1,
      wblk2, brow2, grow2, berow2,
      wfc2, bfcp)
    return out[:, :FC_OUT]


# ------------------------------- reference -------------------------------

def reference(x, params):
    (w1, b1, g1, be1, w2, b2, g2, be2, wfc, bfc) = params

    def conv(x, w, b):
        y = jax.lax.conv_general_dilated(
            x, w, (1, 1), ((1, 1), (1, 1)),
            dimension_numbers=("NCHW", "OIHW", "NCHW"))
        return y + b.reshape(1, -1, 1, 1)

    def bn(x, g, be):
        mean = x.mean(axis=(0, 2, 3), keepdims=True)
        var = ((x - mean) ** 2).mean(axis=(0, 2, 3), keepdims=True)
        return g.reshape(1, -1, 1, 1) * (x - mean) / jnp.sqrt(var + EPS) \
            + be.reshape(1, -1, 1, 1)

    h1 = jax.nn.relu(bn(conv(x, w1, b1), g1, be1))
    h2 = jax.nn.relu(bn(conv(h1, w2, b2), g2, be2))
    xd = h1 / h2.sum()
    return xd.reshape(N, -1) @ wfc.T + bfc


if __name__ == "__main__":
    key = jax.random.PRNGKey(0)
    ks = jax.random.split(key, 12)
    f32 = jnp.float32

    params = (
        0.10 * jax.random.normal(ks[0], (C, C, 3, 3), f32),          # conv.weight
        0.10 * jax.random.normal(ks[1], (C,), f32),                  # conv.bias
        1.0 + 0.10 * jax.random.normal(ks[2], (C,), f32),            # bn.gamma
        0.10 * jax.random.normal(ks[3], (C,), f32),                  # bn.beta
        0.10 * jax.random.normal(ks[4], (C, C, 3, 3), f32),          # conv1.weight
        0.10 * jax.random.normal(ks[5], (C,), f32),                  # conv1.bias
        1.0 + 0.10 * jax.random.normal(ks[6], (C,), f32),            # bn1.gamma
        0.10 * jax.random.normal(ks[7], (C,), f32),                  # bn1.beta
        0.05 * jax.random.normal(ks[8], (FC_OUT, C * HW), f32),      # fc.weight
        0.10 * jax.random.normal(ks[9], (FC_OUT,), f32),             # fc.bias
    )
    x = jax.random.normal(ks[10], (N, C, H, W), f32)

    packed = pack_params(params)      # one-time repacking, off the hot path
    out = jax.block_until_ready(net_forward(x, packed))
    ref = jax.block_until_ready(reference(x, params))
    np.testing.assert_allclose(np.asarray(out), np.asarray(ref),
                               rtol=2e-2, atol=2e-3)
    print("KERNEL_OK")
</pallas_src>

<mosaic_0001>
module attributes {stable_mosaic.version = 11 : i64} {
  func.func @net_kernel(%arg0: memref<32x128xbf16, #tpu.memory_space<vmem>>, %arg1: memref<128x1152xbf16, #tpu.memory_space<vmem>>, %arg2: memref<32x32xf32, #tpu.memory_space<vmem>>, %arg3: memref<1x128xf32, #tpu.memory_space<vmem>>, %arg4: memref<288x32xbf16, #tpu.memory_space<vmem>>, %arg5: memref<32x1xf32, #tpu.memory_space<vmem>>, %arg6: memref<32x1xf32, #tpu.memory_space<vmem>>, %arg7: memref<32x1xf32, #tpu.memory_space<vmem>>, %arg8: memref<288x32xbf16, #tpu.memory_space<vmem>>, %arg9: memref<32x1xf32, #tpu.memory_space<vmem>>, %arg10: memref<32x1xf32, #tpu.memory_space<vmem>>, %arg11: memref<32x1xf32, #tpu.memory_space<vmem>>, %arg12: memref<1280x128xbf16, #tpu.memory_space<any>>, %arg13: memref<1x128xf32, #tpu.memory_space<vmem>>, %arg14: memref<2x128xf32, #tpu.memory_space<vmem>>, %arg15: memref<1280x128xbf16, #tpu.memory_space<vmem>>, %arg16: memref<!tpu.dma_semaphore, #tpu.memory_space<semaphore_mem>>) attributes {dimension_semantics = [], scalar_prefetch = 0 : i64, scratch_operands = 2 : i64, tpu.core_type = #tpu.core_type<tc>} {
    tpu.enqueue_dma source(%arg12 : memref<1280x128xbf16, #tpu.memory_space<any>>) target(%arg15 : memref<1280x128xbf16, #tpu.memory_space<vmem>>) target_semaphore(%arg16 : memref<!tpu.dma_semaphore, #tpu.memory_space<semaphore_mem>>)
    %c0 = arith.constant 0 : index
    %c0_0 = arith.constant 0 : index
    %0 = vector.load %arg1[%c0, %c0_0] : memref<128x1152xbf16, #tpu.memory_space<vmem>>, vector<128x1152xbf16>
    %c0_1 = arith.constant 0 : index
    %c0_2 = arith.constant 0 : index
    %1 = vector.load %arg2[%c0_1, %c0_2] : memref<32x32xf32, #tpu.memory_space<vmem>>, vector<32x32xf32>
    %c0_3 = arith.constant 0 : index
    %c0_4 = arith.constant 0 : index
    %2 = vector.load %arg3[%c0_3, %c0_4] : memref<1x128xf32, #tpu.memory_space<vmem>>, vector<1x128xf32>
    %c0_5 = arith.constant 0 : index
    %c0_6 = arith.constant 0 : index
    %3 = vector.load %arg0[%c0_5, %c0_6] : memref<32x128xbf16, #tpu.memory_space<vmem>>, vector<32x128xbf16>
    %cst = arith.constant dense<0.000000e+00> : vector<32x1152xf32>
    %4 = tpu.matmul %3, %0, %cst {dimension_numbers = #tpu.dot_dimension_numbers<[1], [0], [0], [1], [0, 0, 1, 1], [], []>} : vector<32x128xbf16>, vector<128x1152xbf16>, vector<32x1152xf32> -> vector<32x1152xf32>
    %5 = arith.truncf %4 : vector<32x1152xf32> to vector<32x1152xbf16>
    %cst_7 = arith.constant 0.000000e+00 : f32
    %6 = vector.broadcast %cst_7 : f32 to vector<32x128xf32>
    %c0_8 = arith.constant 0 : index
    %c0_9 = arith.constant 0 : index
    %7 = vector.load %arg4[%c0_8, %c0_9] : memref<288x32xbf16, #tpu.memory_space<vmem>>, vector<32x32xbf16>
    %8 = vector.extract_strided_slice %5 {offsets = [0, 0], sizes = [32, 128], strides = [1, 1]} : vector<32x1152xbf16> to vector<32x128xbf16>
    %cst_10 = arith.constant dense<0.000000e+00> : vector<32x128xf32>
    %9 = tpu.matmul %7, %8, %cst_10 {dimension_numbers = #tpu.dot_dimension_numbers<[1], [0], [0], [1], [0, 0, 1, 1], [], []>} : vector<32x32xbf16>, vector<32x128xbf16>, vector<32x128xf32> -> vector<32x128xf32>
    %10 = arith.addf %6, %9 : vector<32x128xf32>
    %c32 = arith.constant 32 : index
    %c0_11 = arith.constant 0 : index
    %11 = vector.load %arg4[%c32, %c0_11] : memref<288x32xbf16, #tpu.memory_space<vmem>>, vector<32x32xbf16>
    %12 = vector.extract_strided_slice %5 {offsets = [0, 128], sizes = [32, 128], strides = [1, 1]} : vector<32x1152xbf16> to vector<32x128xbf16>
    %cst_12 = arith.constant dense<0.000000e+00> : vector<32x128xf32>
    %13 = tpu.matmul %11, %12, %cst_12 {dimension_numbers = #tpu.dot_dimension_numbers<[1], [0], [0], [1], [0, 0, 1, 1], [], []>} : vector<32x32xbf16>, vector<32x128xbf16>, vector<32x128xf32> -> vector<32x128xf32>
    %14 = arith.addf %10, %13 : vector<32x128xf32>
    %c64 = arith.constant 64 : index
    %c0_13 = arith.constant 0 : index
    %15 = vector.load %arg4[%c64, %c0_13] : memref<288x32xbf16, #tpu.memory_space<vmem>>, vector<32x32xbf16>
    %16 = vector.extract_strided_slice %5 {offsets = [0, 256], sizes = [32, 128], strides = [1, 1]} : vector<32x1152xbf16> to vector<32x128xbf16>
    %cst_14 = arith.constant dense<0.000000e+00> : vector<32x128xf32>
    %17 = tpu.matmul %15, %16, %cst_14 {dimension_numbers = #tpu.dot_dimension_numbers<[1], [0], [0], [1], [0, 0, 1, 1], [], []>} : vector<32x32xbf16>, vector<32x128xbf16>, vector<32x128xf32> -> vector<32x128xf32>
    %18 = arith.addf %14, %17 : vector<32x128xf32>
    %c96 = arith.constant 96 : index
    %c0_15 = arith.constant 0 : index
    %19 = vector.load %arg4[%c96, %c0_15] : memref<288x32xbf16, #tpu.memory_space<vmem>>, vector<32x32xbf16>
    %20 = vector.extract_strided_slice %5 {offsets = [0, 384], sizes = [32, 128], strides = [1, 1]} : vector<32x1152xbf16> to vector<32x128xbf16>
    %cst_16 = arith.constant dense<0.000000e+00> : vector<32x128xf32>
    %21 = tpu.matmul %19, %20, %cst_16 {dimension_numbers = #tpu.dot_dimension_numbers<[1], [0], [0], [1], [0, 0, 1, 1], [], []>} : vector<32x32xbf16>, vector<32x128xbf16>, vector<32x128xf32> -> vector<32x128xf32>
    %22 = arith.addf %18, %21 : vector<32x128xf32>
    %c128 = arith.constant 128 : index
    %c0_17 = arith.constant 0 : index
    %23 = vector.load %arg4[%c128, %c0_17] : memref<288x32xbf16, #tpu.memory_space<vmem>>, vector<32x32xbf16>
    %24 = vector.extract_strided_slice %5 {offsets = [0, 512], sizes = [32, 128], strides = [1, 1]} : vector<32x1152xbf16> to vector<32x128xbf16>
    %cst_18 = arith.constant dense<0.000000e+00> : vector<32x128xf32>
    %25 = tpu.matmul %23, %24, %cst_18 {dimension_numbers = #tpu.dot_dimension_numbers<[1], [0], [0], [1], [0, 0, 1, 1], [], []>} : vector<32x32xbf16>, vector<32x128xbf16>, vector<32x128xf32> -> vector<32x128xf32>
    %26 = arith.addf %22, %25 : vector<32x128xf32>
    %c160 = arith.constant 160 : index
    %c0_19 = arith.constant 0 : index
    %27 = vector.load %arg4[%c160, %c0_19] : memref<288x32xbf16, #tpu.memory_space<vmem>>, vector<32x32xbf16>
    %28 = vector.extract_strided_slice %5 {offsets = [0, 640], sizes = [32, 128], strides = [1, 1]} : vector<32x1152xbf16> to vector<32x128xbf16>
    %cst_20 = arith.constant dense<0.000000e+00> : vector<32x128xf32>
    %29 = tpu.matmul %27, %28, %cst_20 {dimension_numbers = #tpu.dot_dimension_numbers<[1], [0], [0], [1], [0, 0, 1, 1], [], []>} : vector<32x32xbf16>, vector<32x128xbf16>, vector<32x128xf32> -> vector<32x128xf32>
    %30 = arith.addf %26, %29 : vector<32x128xf32>
    %c192 = arith.constant 192 : index
    %c0_21 = arith.constant 0 : index
    %31 = vector.load %arg4[%c192, %c0_21] : memref<288x32xbf16, #tpu.memory_space<vmem>>, vector<32x32xbf16>
    %32 = vector.extract_strided_slice %5 {offsets = [0, 768], sizes = [32, 128], strides = [1, 1]} : vector<32x1152xbf16> to vector<32x128xbf16>
    %cst_22 = arith.constant dense<0.000000e+00> : vector<32x128xf32>
    %33 = tpu.matmul %31, %32, %cst_22 {dimension_numbers = #tpu.dot_dimension_numbers<[1], [0], [0], [1], [0, 0, 1, 1], [], []>} : vector<32x32xbf16>, vector<32x128xbf16>, vector<32x128xf32> -> vector<32x128xf32>
    %34 = arith.addf %30, %33 : vector<32x128xf32>
    %c224 = arith.constant 224 : index
    %c0_23 = arith.constant 0 : index
    %35 = vector.load %arg4[%c224, %c0_23] : memref<288x32xbf16, #tpu.memory_space<vmem>>, vector<32x32xbf16>
    %36 = vector.extract_strided_slice %5 {offsets = [0, 896], sizes = [32, 128], strides = [1, 1]} : vector<32x1152xbf16> to vector<32x128xbf16>
    %cst_24 = arith.constant dense<0.000000e+00> : vector<32x128xf32>
    %37 = tpu.matmul %35, %36, %cst_24 {dimension_numbers = #tpu.dot_dimension_numbers<[1], [0], [0], [1], [0, 0, 1, 1], [], []>} : vector<32x32xbf16>, vector<32x128xbf16>, vector<32x128xf32> -> vector<32x128xf32>
    %38 = arith.addf %34, %37 : vector<32x128xf32>
    %c256 = arith.constant 256 : index
    %c0_25 = arith.constant 0 : index
    %39 = vector.load %arg4[%c256, %c0_25] : memref<288x32xbf16, #tpu.memory_space<vmem>>, vector<32x32xbf16>
    %40 = vector.extract_strided_slice %5 {offsets = [0, 1024], sizes = [32, 128], strides = [1, 1]} : vector<32x1152xbf16> to vector<32x128xbf16>
    %cst_26 = arith.constant dense<0.000000e+00> : vector<32x128xf32>
    %41 = tpu.matmul %39, %40, %cst_26 {dimension_numbers = #tpu.dot_dimension_numbers<[1], [0], [0], [1], [0, 0, 1, 1], [], []>} : vector<32x32xbf16>, vector<32x128xbf16>, vector<32x128xf32> -> vector<32x128xf32>
    %42 = arith.addf %38, %41 : vector<32x128xf32>
    %c0_27 = arith.constant 0 : index
    %c0_28 = arith.constant 0 : index
    %43 = vector.load %arg5[%c0_27, %c0_28] : memref<32x1xf32, #tpu.memory_space<vmem>>, vector<32x1xf32>
    %44 = vector.broadcast %43 : vector<32x1xf32> to vector<32x128xf32>
    %45 = vector.broadcast %2 : vector<1x128xf32> to vector<32x128xf32>
    %46 = arith.mulf %44, %45 : vector<32x128xf32>
    %47 = arith.addf %42, %46 : vector<32x128xf32>
    %cst_29 = arith.constant dense<0.000000e+00> : vector<32x128xf32>
    %48 = tpu.matmul %1, %47, %cst_29 {dimension_numbers = #tpu.dot_dimension_numbers<[1], [0], [0], [1], [0, 0, 1, 1], [], []>} : vector<32x32xf32>, vector<32x128xf32>, vector<32x128xf32> -> vector<32x128xf32>
    %cst_30 = arith.constant dense<0.000000e+00> : vector<32xf32>
    %49 = vector.multi_reduction <add>, %48, %cst_30 [1] : vector<32x128xf32> to vector<32xf32>
    %50 = vector.shape_cast %49 : vector<32xf32> to vector<32x1xf32>
    %51 = arith.mulf %47, %47 : vector<32x128xf32>
    %cst_31 = arith.constant dense<0.000000e+00> : vector<32x128xf32>
    %52 = tpu.matmul %1, %51, %cst_31 {dimension_numbers = #tpu.dot_dimension_numbers<[1], [0], [0], [1], [0, 0, 1, 1], [], []>} : vector<32x32xf32>, vector<32x128xf32>, vector<32x128xf32> -> vector<32x128xf32>
    %cst_32 = arith.constant dense<0.000000e+00> : vector<32xf32>
    %53 = vector.multi_reduction <add>, %52, %cst_32 [1] : vector<32x128xf32> to vector<32xf32>
    %54 = vector.shape_cast %53 : vector<32xf32> to vector<32x1xf32>
    %cst_33 = arith.constant 5.000000e-03 : f32
    %55 = vector.broadcast %cst_33 : f32 to vector<32x1xf32>
    %56 = arith.mulf %50, %55 : vector<32x1xf32>
    %cst_34 = arith.constant 5.000000e-03 : f32
    %57 = vector.broadcast %cst_34 : f32 to vector<32x1xf32>
    %58 = arith.mulf %54, %57 : vector<32x1xf32>
    %59 = arith.mulf %56, %56 : vector<32x1xf32>
    %60 = arith.subf %58, %59 : vector<32x1xf32>
    %c0_35 = arith.constant 0 : index
    %c0_36 = arith.constant 0 : index
    %61 = vector.load %arg6[%c0_35, %c0_36] : memref<32x1xf32, #tpu.memory_space<vmem>>, vector<32x1xf32>
    %cst_37 = arith.constant 9.99999974E-6 : f32
    %62 = vector.broadcast %cst_37 : f32 to vector<32x1xf32>
    %63 = arith.addf %60, %62 : vector<32x1xf32>
    %64 = math.rsqrt %63 : vector<32x1xf32>
    %65 = arith.mulf %61, %64 : vector<32x1xf32>
    %c0_38 = arith.constant 0 : index
    %c0_39 = arith.constant 0 : index
    %66 = vector.load %arg7[%c0_38, %c0_39] : memref<32x1xf32, #tpu.memory_space<vmem>>, vector<32x1xf32>
    %67 = arith.mulf %56, %65 : vector<32x1xf32>
    %68 = arith.subf %66, %67 : vector<32x1xf32>
    %69 = vector.broadcast %65 : vector<32x1xf32> to vector<32x128xf32>
    %70 = arith.mulf %47, %69 : vector<32x128xf32>
    %71 = vector.broadcast %68 : vector<32x1xf32> to vector<32x128xf32>
    %72 = arith.addf %70, %71 : vector<32x128xf32>
    %cst_40 = arith.constant 0.000000e+00 : f32
    %73 = vector.broadcast %cst_40 : f32 to vector<32x128xf32>
    %74 = arith.maximumf %72, %73 : vector<32x128xf32>
    %75 = vector.broadcast %2 : vector<1x128xf32> to vector<32x128xf32>
    %76 = arith.mulf %74, %75 : vector<32x128xf32>
    %77 = arith.truncf %76 : vector<32x128xf32> to vector<32x128xbf16>
    %cst_41 = arith.constant dense<0.000000e+00> : vector<32x1152xf32>
    %78 = tpu.matmul %77, %0, %cst_41 {dimension_numbers = #tpu.dot_dimension_numbers<[1], [0], [0], [1], [0, 0, 1, 1], [], []>} : vector<32x128xbf16>, vector<128x1152xbf16>, vector<32x1152xf32> -> vector<32x1152xf32>
    %79 = arith.truncf %78 : vector<32x1152xf32> to vector<32x1152xbf16>
    %cst_42 = arith.constant 0.000000e+00 : f32
    %80 = vector.broadcast %cst_42 : f32 to vector<32x128xf32>
    %c0_43 = arith.constant 0 : index
    %c0_44 = arith.constant 0 : index
    %81 = vector.load %arg8[%c0_43, %c0_44] : memref<288x32xbf16, #tpu.memory_space<vmem>>, vector<32x32xbf16>
    %82 = vector.extract_strided_slice %79 {offsets = [0, 0], sizes = [32, 128], strides = [1, 1]} : vector<32x1152xbf16> to vector<32x128xbf16>
    %cst_45 = arith.constant dense<0.000000e+00> : vector<32x128xf32>
    %83 = tpu.matmul %81, %82, %cst_45 {dimension_numbers = #tpu.dot_dimension_numbers<[1], [0], [0], [1], [0, 0, 1, 1], [], []>} : vector<32x32xbf16>, vector<32x128xbf16>, vector<32x128xf32> -> vector<32x128xf32>
    %84 = arith.addf %80, %83 : vector<32x128xf32>
    %c32_46 = arith.constant 32 : index
    %c0_47 = arith.constant 0 : index
    %85 = vector.load %arg8[%c32_46, %c0_47] : memref<288x32xbf16, #tpu.memory_space<vmem>>, vector<32x32xbf16>
    %86 = vector.extract_strided_slice %79 {offsets = [0, 128], sizes = [32, 128], strides = [1, 1]} : vector<32x1152xbf16> to vector<32x128xbf16>
    %cst_48 = arith.constant dense<0.000000e+00> : vector<32x128xf32>
    %87 = tpu.matmul %85, %86, %cst_48 {dimension_numbers = #tpu.dot_dimension_numbers<[1], [0], [0], [1], [0, 0, 1, 1], [], []>} : vector<32x32xbf16>, vector<32x128xbf16>, vector<32x128xf32> -> vector<32x128xf32>
    %88 = arith.addf %84, %87 : vector<32x128xf32>
    %c64_49 = arith.constant 64 : index
    %c0_50 = arith.constant 0 : index
    %89 = vector.load %arg8[%c64_49, %c0_50] : memref<288x32xbf16, #tpu.memory_space<vmem>>, vector<32x32xbf16>
    %90 = vector.extract_strided_slice %79 {offsets = [0, 256], sizes = [32, 128], strides = [1, 1]} : vector<32x1152xbf16> to vector<32x128xbf16>
    %cst_51 = arith.constant dense<0.000000e+00> : vector<32x128xf32>
    %91 = tpu.matmul %89, %90, %cst_51 {dimension_numbers = #tpu.dot_dimension_numbers<[1], [0], [0], [1], [0, 0, 1, 1], [], []>} : vector<32x32xbf16>, vector<32x128xbf16>, vector<32x128xf32> -> vector<32x128xf32>
    %92 = arith.addf %88, %91 : vector<32x128xf32>
    %c96_52 = arith.constant 96 : index
    %c0_53 = arith.constant 0 : index
    %93 = vector.load %arg8[%c96_52, %c0_53] : memref<288x32xbf16, #tpu.memory_space<vmem>>, vector<32x32xbf16>
    %94 = vector.extract_strided_slice %79 {offsets = [0, 384], sizes = [32, 128], strides = [1, 1]} : vector<32x1152xbf16> to vector<32x128xbf16>
    %cst_54 = arith.constant dense<0.000000e+00> : vector<32x128xf32>
    %95 = tpu.matmul %93, %94, %cst_54 {dimension_numbers = #tpu.dot_dimension_numbers<[1], [0], [0], [1], [0, 0, 1, 1], [], []>} : vector<32x32xbf16>, vector<32x128xbf16>, vector<32x128xf32> -> vector<32x128xf32>
    %96 = arith.addf %92, %95 : vector<32x128xf32>
    %c128_55 = arith.constant 128 : index
    %c0_56 = arith.constant 0 : index
    %97 = vector.load %arg8[%c128_55, %c0_56] : memref<288x32xbf16, #tpu.memory_space<vmem>>, vector<32x32xbf16>
    %98 = vector.extract_strided_slice %79 {offsets = [0, 512], sizes = [32, 128], strides = [1, 1]} : vector<32x1152xbf16> to vector<32x128xbf16>
    %cst_57 = arith.constant dense<0.000000e+00> : vector<32x128xf32>
    %99 = tpu.matmul %97, %98, %cst_57 {dimension_numbers = #tpu.dot_dimension_numbers<[1], [0], [0], [1], [0, 0, 1, 1], [], []>} : vector<32x32xbf16>, vector<32x128xbf16>, vector<32x128xf32> -> vector<32x128xf32>
    %100 = arith.addf %96, %99 : vector<32x128xf32>
    %c160_58 = arith.constant 160 : index
    %c0_59 = arith.constant 0 : index
    %101 = vector.load %arg8[%c160_58, %c0_59] : memref<288x32xbf16, #tpu.memory_space<vmem>>, vector<32x32xbf16>
    %102 = vector.extract_strided_slice %79 {offsets = [0, 640], sizes = [32, 128], strides = [1, 1]} : vector<32x1152xbf16> to vector<32x128xbf16>
    %cst_60 = arith.constant dense<0.000000e+00> : vector<32x128xf32>
    %103 = tpu.matmul %101, %102, %cst_60 {dimension_numbers = #tpu.dot_dimension_numbers<[1], [0], [0], [1], [0, 0, 1, 1], [], []>} : vector<32x32xbf16>, vector<32x128xbf16>, vector<32x128xf32> -> vector<32x128xf32>
    %104 = arith.addf %100, %103 : vector<32x128xf32>
    %c192_61 = arith.constant 192 : index
    %c0_62 = arith.constant 0 : index
    %105 = vector.load %arg8[%c192_61, %c0_62] : memref<288x32xbf16, #tpu.memory_space<vmem>>, vector<32x32xbf16>
    %106 = vector.extract_strided_slice %79 {offsets = [0, 768], sizes = [32, 128], strides = [1, 1]} : vector<32x1152xbf16> to vector<32x128xbf16>
    %cst_63 = arith.constant dense<0.000000e+00> : vector<32x128xf32>
    %107 = tpu.matmul %105, %106, %cst_63 {dimension_numbers = #tpu.dot_dimension_numbers<[1], [0], [0], [1], [0, 0, 1, 1], [], []>} : vector<32x32xbf16>, vector<32x128xbf16>, vector<32x128xf32> -> vector<32x128xf32>
    %108 = arith.addf %104, %107 : vector<32x128xf32>
    %c224_64 = arith.constant 224 : index
    %c0_65 = arith.constant 0 : index
    %109 = vector.load %arg8[%c224_64, %c0_65] : memref<288x32xbf16, #tpu.memory_space<vmem>>, vector<32x32xbf16>
    %110 = vector.extract_strided_slice %79 {offsets = [0, 896], sizes = [32, 128], strides = [1, 1]} : vector<32x1152xbf16> to vector<32x128xbf16>
    %cst_66 = arith.constant dense<0.000000e+00> : vector<32x128xf32>
    %111 = tpu.matmul %109, %110, %cst_66 {dimension_numbers = #tpu.dot_dimension_numbers<[1], [0], [0], [1], [0, 0, 1, 1], [], []>} : vector<32x32xbf16>, vector<32x128xbf16>, vector<32x128xf32> -> vector<32x128xf32>
    %112 = arith.addf %108, %111 : vector<32x128xf32>
    %c256_67 = arith.constant 256 : index
    %c0_68 = arith.constant 0 : index
    %113 = vector.load %arg8[%c256_67, %c0_68] : memref<288x32xbf16, #tpu.memory_space<vmem>>, vector<32x32xbf16>
    %114 = vector.extract_strided_slice %79 {offsets = [0, 1024], sizes = [32, 128], strides = [1, 1]} : vector<32x1152xbf16> to vector<32x128xbf16>
    %cst_69 = arith.constant dense<0.000000e+00> : vector<32x128xf32>
    %115 = tpu.matmul %113, %114, %cst_69 {dimension_numbers = #tpu.dot_dimension_numbers<[1], [0], [0], [1], [0, 0, 1, 1], [], []>} : vector<32x32xbf16>, vector<32x128xbf16>, vector<32x128xf32> -> vector<32x128xf32>
    %116 = arith.addf %112, %115 : vector<32x128xf32>
    %c0_70 = arith.constant 0 : index
    %c0_71 = arith.constant 0 : index
    %117 = vector.load %arg9[%c0_70, %c0_71] : memref<32x1xf32, #tpu.memory_space<vmem>>, vector<32x1xf32>
    %118 = vector.broadcast %117 : vector<32x1xf32> to vector<32x128xf32>
    %119 = vector.broadcast %2 : vector<1x128xf32> to vector<32x128xf32>
    %120 = arith.mulf %118, %119 : vector<32x128xf32>
    %121 = arith.addf %116, %120 : vector<32x128xf32>
    %cst_72 = arith.constant dense<0.000000e+00> : vector<32x128xf32>
    %122 = tpu.matmul %1, %121, %cst_72 {dimension_numbers = #tpu.dot_dimension_numbers<[1], [0], [0], [1], [0, 0, 1, 1], [], []>} : vector<32x32xf32>, vector<32x128xf32>, vector<32x128xf32> -> vector<32x128xf32>
    %cst_73 = arith.constant dense<0.000000e+00> : vector<32xf32>
    %123 = vector.multi_reduction <add>, %122, %cst_73 [1] : vector<32x128xf32> to vector<32xf32>
    %124 = vector.shape_cast %123 : vector<32xf32> to vector<32x1xf32>
    %125 = arith.mulf %121, %121 : vector<32x128xf32>
    %cst_74 = arith.constant dense<0.000000e+00> : vector<32x128xf32>
    %126 = tpu.matmul %1, %125, %cst_74 {dimension_numbers = #tpu.dot_dimension_numbers<[1], [0], [0], [1], [0, 0, 1, 1], [], []>} : vector<32x32xf32>, vector<32x128xf32>, vector<32x128xf32> -> vector<32x128xf32>
    %cst_75 = arith.constant dense<0.000000e+00> : vector<32xf32>
    %127 = vector.multi_reduction <add>, %126, %cst_75 [1] : vector<32x128xf32> to vector<32xf32>
    %128 = vector.shape_cast %127 : vector<32xf32> to vector<32x1xf32>
    %cst_76 = arith.constant 5.000000e-03 : f32
    %129 = vector.broadcast %cst_76 : f32 to vector<32x1xf32>
    %130 = arith.mulf %124, %129 : vector<32x1xf32>
    %cst_77 = arith.constant 5.000000e-03 : f32
    %131 = vector.broadcast %cst_77 : f32 to vector<32x1xf32>
    %132 = arith.mulf %128, %131 : vector<32x1xf32>
    %133 = arith.mulf %130, %130 : vector<32x1xf32>
    %134 = arith.subf %132, %133 : vector<32x1xf32>
    %c0_78 = arith.constant 0 : index
    %c0_79 = arith.constant 0 : index
    %135 = vector.load %arg10[%c0_78, %c0_79] : memref<32x1xf32, #tpu.memory_space<vmem>>, vector<32x1xf32>
    %cst_80 = arith.constant 9.99999974E-6 : f32
    %136 = vector.broadcast %cst_80 : f32 to vector<32x1xf32>
    %137 = arith.addf %134, %136 : vector<32x1xf32>
    %138 = math.rsqrt %137 : vector<32x1xf32>
    %139 = arith.mulf %135, %138 : vector<32x1xf32>
    %c0_81 = arith.constant 0 : index
    %c0_82 = arith.constant 0 : index
    %140 = vector.load %arg11[%c0_81, %c0_82] : memref<32x1xf32, #tpu.memory_space<vmem>>, vector<32x1xf32>
    %141 = arith.mulf %130, %139 : vector<32x1xf32>
    %142 = arith.subf %140, %141 : vector<32x1xf32>
    %143 = vector.broadcast %139 : vector<32x1xf32> to vector<32x128xf32>
    %144 = arith.mulf %121, %143 : vector<32x128xf32>
    %145 = vector.broadcast %142 : vector<32x1xf32> to vector<32x128xf32>
    %146 = arith.addf %144, %145 : vector<32x128xf32>
    %cst_83 = arith.constant 0.000000e+00 : f32
    %147 = vector.broadcast %cst_83 : f32 to vector<32x128xf32>
    %148 = arith.maximumf %146, %147 : vector<32x128xf32>
    %149 = vector.broadcast %2 : vector<1x128xf32> to vector<32x128xf32>
    %150 = arith.mulf %148, %149 : vector<32x128xf32>
    %151 = vector.shape_cast %150 : vector<32x128xf32> to vector<1x32x128xf32>
    %cst_84 = arith.constant dense<0.000000e+00> : vector<1xf32>
    %152 = vector.multi_reduction <add>, %151, %cst_84 [1, 2] : vector<1x32x128xf32> to vector<1xf32>
    %153 = vector.shape_cast %152 : vector<1xf32> to vector<1x1x1xf32>
    %154 = vector.extract %153[0, 0, 0] : f32 from vector<1x1x1xf32>
    %155 = vector.broadcast %154 : f32 to vector<1x1xf32>
    %156 = tpu.reciprocal %155 : vector<1x1xf32> -> vector<1x1xf32>
    %157 = vector.broadcast %156 : vector<1x1xf32> to vector<32x128xf32>
    %158 = arith.mulf %76, %157 : vector<32x128xf32>
    %159 = arith.truncf %158 : vector<32x128xf32> to vector<32x128xbf16>
    tpu.wait_dma2 semaphore(%arg16 : memref<!tpu.dma_semaphore, #tpu.memory_space<semaphore_mem>>) src(%arg12 : memref<1280x128xbf16, #tpu.memory_space<any>>) dst(%arg15 : memref<1280x128xbf16, #tpu.memory_space<vmem>>)
    %cst_85 = arith.constant 0.000000e+00 : f32
    %160 = vector.broadcast %cst_85 : f32 to vector<2x128xf32>
    %161 = vector.extract_strided_slice %159 {offsets = [0, 0], sizes = [2, 128], strides = [1, 1]} : vector<32x128xbf16> to vector<2x128xbf16>
    %c0_86 = arith.constant 0 : index
    %c0_87 = arith.constant 0 : index
    %162 = vector.load %arg15[%c0_86, %c0_87] : memref<1280x128xbf16, #tpu.memory_space<vmem>>, vector<128x128xbf16>
    %cst_88 = arith.constant dense<0.000000e+00> : vector<2x128xf32>
    %163 = tpu.matmul %161, %162, %cst_88 {dimension_numbers = #tpu.dot_dimension_numbers<[1], [0], [0], [1], [0, 0, 1, 1], [], []>} : vector<2x128xbf16>, vector<128x128xbf16>, vector<2x128xf32> -> vector<2x128xf32>
    %164 = arith.addf %160, %163 : vector<2x128xf32>
    %165 = vector.extract_strided_slice %159 {offsets = [2, 0], sizes = [2, 128], strides = [1, 1]} : vector<32x128xbf16> to vector<2x128xbf16>
    %c128_89 = arith.constant 128 : index
    %c0_90 = arith.constant 0 : index
    %166 = vector.load %arg15[%c128_89, %c0_90] : memref<1280x128xbf16, #tpu.memory_space<vmem>>, vector<128x128xbf16>
    %cst_91 = arith.constant dense<0.000000e+00> : vector<2x128xf32>
    %167 = tpu.matmul %165, %166, %cst_91 {dimension_numbers = #tpu.dot_dimension_numbers<[1], [0], [0], [1], [0, 0, 1, 1], [], []>} : vector<2x128xbf16>, vector<128x128xbf16>, vector<2x128xf32> -> vector<2x128xf32>
    %168 = arith.addf %164, %167 : vector<2x128xf32>
    %169 = vector.extract_strided_slice %159 {offsets = [4, 0], sizes = [2, 128], strides = [1, 1]} : vector<32x128xbf16> to vector<2x128xbf16>
    %c256_92 = arith.constant 256 : index
    %c0_93 = arith.constant 0 : index
    %170 = vector.load %arg15[%c256_92, %c0_93] : memref<1280x128xbf16, #tpu.memory_space<vmem>>, vector<128x128xbf16>
    %cst_94 = arith.constant dense<0.000000e+00> : vector<2x128xf32>
    %171 = tpu.matmul %169, %170, %cst_94 {dimension_numbers = #tpu.dot_dimension_numbers<[1], [0], [0], [1], [0, 0, 1, 1], [], []>} : vector<2x128xbf16>, vector<128x128xbf16>, vector<2x128xf32> -> vector<2x128xf32>
    %172 = arith.addf %168, %171 : vector<2x128xf32>
    %173 = vector.extract_strided_slice %159 {offsets = [6, 0], sizes = [2, 128], strides = [1, 1]} : vector<32x128xbf16> to vector<2x128xbf16>
    %c384 = arith.constant 384 : index
    %c0_95 = arith.constant 0 : index
    %174 = vector.load %arg15[%c384, %c0_95] : memref<1280x128xbf16, #tpu.memory_space<vmem>>, vector<128x128xbf16>
    %cst_96 = arith.constant dense<0.000000e+00> : vector<2x128xf32>
    %175 = tpu.matmul %173, %174, %cst_96 {dimension_numbers = #tpu.dot_dimension_numbers<[1], [0], [0], [1], [0, 0, 1, 1], [], []>} : vector<2x128xbf16>, vector<128x128xbf16>, vector<2x128xf32> -> vector<2x128xf32>
    %176 = arith.addf %172, %175 : vector<2x128xf32>
    %177 = vector.extract_strided_slice %159 {offsets = [8, 0], sizes = [2, 128], strides = [1, 1]} : vector<32x128xbf16> to vector<2x128xbf16>
    %c512 = arith.constant 512 : index
    %c0_97 = arith.constant 0 : index
    %178 = vector.load %arg15[%c512, %c0_97] : memref<1280x128xbf16, #tpu.memory_space<vmem>>, vector<128x128xbf16>
    %cst_98 = arith.constant dense<0.000000e+00> : vector<2x128xf32>
    %179 = tpu.matmul %177, %178, %cst_98 {dimension_numbers = #tpu.dot_dimension_numbers<[1], [0], [0], [1], [0, 0, 1, 1], [], []>} : vector<2x128xbf16>, vector<128x128xbf16>, vector<2x128xf32> -> vector<2x128xf32>
    %180 = arith.addf %176, %179 : vector<2x128xf32>
    %181 = vector.extract_strided_slice %159 {offsets = [10, 0], sizes = [2, 128], strides = [1, 1]} : vector<32x128xbf16> to vector<2x128xbf16>
    %c640 = arith.constant 640 : index
    %c0_99 = arith.constant 0 : index
    %182 = vector.load %arg15[%c640, %c0_99] : memref<1280x128xbf16, #tpu.memory_space<vmem>>, vector<128x128xbf16>
    %cst_100 = arith.constant dense<0.000000e+00> : vector<2x128xf32>
    %183 = tpu.matmul %181, %182, %cst_100 {dimension_numbers = #tpu.dot_dimension_numbers<[1], [0], [0], [1], [0, 0, 1, 1], [], []>} : vector<2x128xbf16>, vector<128x128xbf16>, vector<2x128xf32> -> vector<2x128xf32>
    %184 = arith.addf %180, %183 : vector<2x128xf32>
    %185 = vector.extract_strided_slice %159 {offsets = [12, 0], sizes = [2, 128], strides = [1, 1]} : vector<32x128xbf16> to vector<2x128xbf16>
    %c768 = arith.constant 768 : index
    %c0_101 = arith.constant 0 : index
    %186 = vector.load %arg15[%c768, %c0_101] : memref<1280x128xbf16, #tpu.memory_space<vmem>>, vector<128x128xbf16>
    %cst_102 = arith.constant dense<0.000000e+00> : vector<2x128xf32>
    %187 = tpu.matmul %185, %186, %cst_102 {dimension_numbers = #tpu.dot_dimension_numbers<[1], [0], [0], [1], [0, 0, 1, 1], [], []>} : vector<2x128xbf16>, vector<128x128xbf16>, vector<2x128xf32> -> vector<2x128xf32>
    %188 = arith.addf %184, %187 : vector<2x128xf32>
    %189 = vector.extract_strided_slice %159 {offsets = [14, 0], sizes = [2, 128], strides = [1, 1]} : vector<32x128xbf16> to vector<2x128xbf16>
    %c896 = arith.constant 896 : index
    %c0_103 = arith.constant 0 : index
    %190 = vector.load %arg15[%c896, %c0_103] : memref<1280x128xbf16, #tpu.memory_space<vmem>>, vector<128x128xbf16>
    %cst_104 = arith.constant dense<0.000000e+00> : vector<2x128xf32>
    %191 = tpu.matmul %189, %190, %cst_104 {dimension_numbers = #tpu.dot_dimension_numbers<[1], [0], [0], [1], [0, 0, 1, 1], [], []>} : vector<2x128xbf16>, vector<128x128xbf16>, vector<2x128xf32> -> vector<2x128xf32>
    %192 = arith.addf %188, %191 : vector<2x128xf32>
    %193 = vector.extract_strided_slice %159 {offsets = [16, 0], sizes = [2, 128], strides = [1, 1]} : vector<32x128xbf16> to vector<2x128xbf16>
    %c1024 = arith.constant 1024 : index
    %c0_105 = arith.constant 0 : index
    %194 = vector.load %arg15[%c1024, %c0_105] : memref<1280x128xbf16, #tpu.memory_space<vmem>>, vector<128x128xbf16>
    %cst_106 = arith.constant dense<0.000000e+00> : vector<2x128xf32>
    %195 = tpu.matmul %193, %194, %cst_106 {dimension_numbers = #tpu.dot_dimension_numbers<[1], [0], [0], [1], [0, 0, 1, 1], [], []>} : vector<2x128xbf16>, vector<128x128xbf16>, vector<2x128xf32> -> vector<2x128xf32>
    %196 = arith.addf %192, %195 : vector<2x128xf32>
    %197 = vector.extract_strided_slice %159 {offsets = [18, 0], sizes = [2, 128], strides = [1, 1]} : vector<32x128xbf16> to vector<2x128xbf16>
    %c1152 = arith.constant 1152 : index
    %c0_107 = arith.constant 0 : index
    %198 = vector.load %arg15[%c1152, %c0_107] : memref<1280x128xbf16, #tpu.memory_space<vmem>>, vector<128x128xbf16>
    %cst_108 = arith.constant dense<0.000000e+00> : vector<2x128xf32>
    %199 = tpu.matmul %197, %198, %cst_108 {dimension_numbers = #tpu.dot_dimension_numbers<[1], [0], [0], [1], [0, 0, 1, 1], [], []>} : vector<2x128xbf16>, vector<128x128xbf16>, vector<2x128xf32> -> vector<2x128xf32>
    %200 = arith.addf %196, %199 : vector<2x128xf32>
    %c0_109 = arith.constant 0 : index
    %c0_110 = arith.constant 0 : index
    %201 = vector.load %arg13[%c0_109, %c0_110] : memref<1x128xf32, #tpu.memory_space<vmem>>, vector<1x128xf32>
    %202 = vector.broadcast %201 : vector<1x128xf32> to vector<2x128xf32>
    %203 = arith.addf %200, %202 : vector<2x128xf32>
    %c0_111 = arith.constant 0 : index
    %c0_112 = arith.constant 0 : index
    %204 = vector.load %arg14[%c0_111, %c0_112] : memref<2x128xf32, #tpu.memory_space<vmem>>, vector<2x128xf32>
    tpu.vector_store %arg14[%c0_111, %c0_112], %203 {strides = array<i32>} : memref<2x128xf32, #tpu.memory_space<vmem>>, vector<2x128xf32>,
    return
  }
}

</mosaic_0001>

<bundles_post_ra>
// kernel: net_forward.1
= control target key start
LH: loop header
LB: loop body
LE: loop exit
PB: predicated region body
PF: predicated region fallthrough
CT: control target
= control target key end

     0   :  { %19 = vsyncpa [#allocation5], 0  ;;  %s6546_s0 = inlined_call_operand.vmem [shape: bf16[32,128], index: 0, kind: input, shape index: {}]   ;;  %s6547_s1 = inlined_call_operand.vmem [shape: bf16[128,1152], index: 1, kind: input, shape index: {}]   ;;  %s6548_s2 = inlined_call_operand.vmem [shape: f32[32,32], index: 2, kind: input, shape index: {}]   ;;  %s6549_s3 = inlined_call_operand.vmem [shape: f32[1,128], index: 3, kind: input, shape index: {}]   ;;  %s6550_s4 = inlined_call_operand.vmem [shape: bf16[288,32], index: 4, kind: input, shape index: {}]   ;;  %s6551_s5 = inlined_call_operand.vmem [shape: f32[32,1], index: 5, kind: input, shape index: {}]   ;;  %s6552_s6 = inlined_call_operand.vmem [shape: f32[32,1], index: 6, kind: input, shape index: {}]   ;;  %s6553_s7 = inlined_call_operand.vmem [shape: f32[32,1], index: 7, kind: input, shape index: {}]   ;;  %s6554_s8 = inlined_call_operand.vmem [shape: bf16[288,32], index: 8, kind: input, shape index: {}]   ;;  %s6555_s9 = inlined_call_operand.vmem [shape: f32[32,1], index: 9, kind: input, shape index: {}]   ;;  %s6556_s10 = inlined_call_operand.vmem [shape: f32[32,1], index: 10, kind: input, shape index: {}]   ;;  %s6557_s11 = inlined_call_operand.vmem [shape: f32[32,1], index: 11, kind: input, shape index: {}]   ;;  %s6558_s12 = inlined_call_operand.vmem [shape: bf16[1280,128], index: 12, kind: input, shape index: {}]   ;;  %s6559_s13 = inlined_call_operand.vmem [shape: f32[1,128], index: 13, kind: input, shape index: {}]   ;;  %s6560_s14 = inlined_call_operand.hbm [shape: f32[2,128], index: 14, kind: output, shape index: {}]  }
   0x1   :  { %v5021_v0 = vld [vmem:[%s6558_s12] sm:$0xff]  ;;  %v5026_v1 = vld [vmem:[%s6558_s12 + $0x8] sm:$0xff]  ;;  %v5031_v2 = vld [vmem:[%s6558_s12 + $0x10] sm:$0xff] }
   0x2   :  { %6568 = vst [vmem:[#allocation9_spill] sm:$0xff] %v5021_v0  ;;  %6569 = vst [vmem:[#allocation10_spill] sm:$0xff] %v5026_v1  ;;  %v5036_v3 = vld [vmem:[%s6558_s12 + $0x18] sm:$0xff]  ;;  %v5041_v4 = vld [vmem:[%s6558_s12 + $0x20] sm:$0xff] }
   0x3   :  { %6570 = vst [vmem:[#allocation11_spill] sm:$0xff] %v5031_v2  ;;  %6571 = vst [vmem:[#allocation12_spill] sm:$0xff] %v5036_v3  ;;  %v5046_v5 = vld [vmem:[%s6558_s12 + $0x28] sm:$0xff]  ;;  %v5051_v6 = vld [vmem:[%s6558_s12 + $0x30] sm:$0xff] }
   0x4   :  { %6572 = vst [vmem:[#allocation13_spill] sm:$0xff] %v5041_v4  ;;  %6573 = vst [vmem:[#allocation14_spill] sm:$0xff] %v5046_v5  ;;  %v5056_v7 = vld [vmem:[%s6558_s12 + $0x38] sm:$0xff]  ;;  %v5061_v8 = vld [vmem:[%s6558_s12 + $0x40] sm:$0xff] }
   0x5   :  { %6574 = vst [vmem:[#allocation15_spill] sm:$0xff] %v5051_v6  ;;  %6575 = vst [vmem:[#allocation16_spill] sm:$0xff] %v5056_v7  ;;  %v5066_v9 = vld [vmem:[%s6558_s12 + $0x48] sm:$0xff]  ;;  %v5071_v10 = vld [vmem:[%s6558_s12 + $0x50] sm:$0xff] }
   0x6   :  { %6576 = vst [vmem:[#allocation17_spill] sm:$0xff] %v5061_v8  ;;  %6577 = vst [vmem:[#allocation18_spill] sm:$0xff] %v5066_v9  ;;  %v5076_v11 = vld [vmem:[%s6558_s12 + $0x58] sm:$0xff]  ;;  %v5081_v12 = vld [vmem:[%s6558_s12 + $0x60] sm:$0xff] }
   0x7   :  { %6578 = vst [vmem:[#allocation19_spill] sm:$0xff] %v5071_v10  ;;  %6579 = vst [vmem:[#allocation20_spill] sm:$0xff] %v5076_v11  ;;  %v5086_v13 = vld [vmem:[%s6558_s12 + $0x68] sm:$0xff]  ;;  %v5091_v14 = vld [vmem:[%s6558_s12 + $0x70] sm:$0xff] }
   0x8   :  { %6580 = vst [vmem:[#allocation21_spill] sm:$0xff] %v5081_v12  ;;  %6581 = vst [vmem:[#allocation22_spill] sm:$0xff] %v5086_v13  ;;  %v5096_v15 = vld [vmem:[%s6558_s12 + $0x78] sm:$0xff]  ;;  %v5101_v16 = vld [vmem:[%s6558_s12 + $0x80] sm:$0xff] }
   0x9   :  { %6582 = vst [vmem:[#allocation23_spill] sm:$0xff] %v5091_v14  ;;  %6583 = vst [vmem:[#allocation24_spill] sm:$0xff] %v5096_v15  ;;  %v5106_v17 = vld [vmem:[%s6558_s12 + $0x88] sm:$0xff]  ;;  %v5111_v18 = vld [vmem:[%s6558_s12 + $0x90] sm:$0xff] }
   0xa   :  { %6584 = vst [vmem:[#allocation25_spill] sm:$0xff] %v5101_v16  ;;  %6585 = vst [vmem:[#allocation26_spill] sm:$0xff] %v5106_v17  ;;  %v5116_v19 = vld [vmem:[%s6558_s12 + $0x98] sm:$0xff]  ;;  %v5121_v20 = vld [vmem:[%s6558_s12 + $0xa0] sm:$0xff] }
   0xb   :  { %6586 = vst [vmem:[#allocation27_spill] sm:$0xff] %v5111_v18  ;;  %6587 = vst [vmem:[#allocation28_spill] sm:$0xff] %v5116_v19  ;;  %v5126_v21 = vld [vmem:[%s6558_s12 + $0xa8] sm:$0xff]  ;;  %v5131_v22 = vld [vmem:[%s6558_s12 + $0xb0] sm:$0xff] }
   0xc   :  { %6588 = vst [vmem:[#allocation29_spill] sm:$0xff] %v5121_v20  ;;  %6589 = vst [vmem:[#allocation30_spill] sm:$0xff] %v5126_v21  ;;  %v5136_v23 = vld [vmem:[%s6558_s12 + $0xb8] sm:$0xff]  ;;  %v5141_v24 = vld [vmem:[%s6558_s12 + $0xc0] sm:$0xff] }
   0xd   :  { %6590 = vst [vmem:[#allocation31_spill] sm:$0xff] %v5131_v22  ;;  %6591 = vst [vmem:[#allocation32_spill] sm:$0xff] %v5136_v23  ;;  %v5146_v25 = vld [vmem:[%s6558_s12 + $0xc8] sm:$0xff]  ;;  %v5151_v26 = vld [vmem:[%s6558_s12 + $0xd0] sm:$0xff] }
   0xe   :  { %6592 = vst [vmem:[#allocation33_spill] sm:$0xff] %v5141_v24  ;;  %6593 = vst [vmem:[#allocation34_spill] sm:$0xff] %v5146_v25  ;;  %v5156_v27 = vld [vmem:[%s6558_s12 + $0xd8] sm:$0xff]  ;;  %v5161_v28 = vld [vmem:[%s6558_s12 + $0xe0] sm:$0xff] }
   0xf   :  { %6594 = vst [vmem:[#allocation35_spill] sm:$0xff] %v5151_v26  ;;  %6595 = vst [vmem:[#allocation36_spill] sm:$0xff] %v5156_v27  ;;  %v5166_v29 = vld [vmem:[%s6558_s12 + $0xe8] sm:$0xff]  ;;  %v5171_v30 = vld [vmem:[%s6558_s12 + $0xf0] sm:$0xff] }
  0x10   :  { %6596 = vst [vmem:[#allocation37_spill] sm:$0xff] %v5161_v28  ;;  %6597 = vst [vmem:[#allocation38_spill] sm:$0xff] %v5166_v29  ;;  %v5176_v31 = vld [vmem:[%s6558_s12 + $0xf8] sm:$0xff]  ;;  %v5181_v32 = vld [vmem:[%s6558_s12 + $0x100] sm:$0xff] }
  0x11   :  { %6598 = vst [vmem:[#allocation39_spill] sm:$0xff] %v5171_v30  ;;  %6599 = vst [vmem:[#allocation40_spill] sm:$0xff] %v5176_v31  ;;  %v5186_v33 = vld [vmem:[%s6558_s12 + $0x108] sm:$0xff]  ;;  %v5191_v34 = vld [vmem:[%s6558_s12 + $0x110] sm:$0xff] }
  0x12   :  { %6600 = vst [vmem:[#allocation41_spill] sm:$0xff] %v5181_v32  ;;  %6601 = vst [vmem:[#allocation42_spill] sm:$0xff] %v5186_v33  ;;  %v5196_v35 = vld [vmem:[%s6558_s12 + $0x118] sm:$0xff]  ;;  %v5201_v36 = vld [vmem:[%s6558_s12 + $0x120] sm:$0xff] }
  0x13   :  { %6602 = vst [vmem:[#allocation43_spill] sm:$0xff] %v5191_v34  ;;  %6603 = vst [vmem:[#allocation44_spill] sm:$0xff] %v5196_v35  ;;  %v5206_v37 = vld [vmem:[%s6558_s12 + $0x128] sm:$0xff]  ;;  %v5211_v38 = vld [vmem:[%s6558_s12 + $0x130] sm:$0xff] }
  0x14   :  { %6604 = vst [vmem:[#allocation45_spill] sm:$0xff] %v5201_v36  ;;  %6605 = vst [vmem:[#allocation46_spill] sm:$0xff] %v5206_v37  ;;  %v5216_v39 = vld [vmem:[%s6558_s12 + $0x138] sm:$0xff]  ;;  %v5221_v40 = vld [vmem:[%s6558_s12 + $0x140] sm:$0xff] }
  0x15   :  { %6606 = vst [vmem:[#allocation47_spill] sm:$0xff] %v5211_v38  ;;  %6607 = vst [vmem:[#allocation48_spill] sm:$0xff] %v5216_v39  ;;  %v5226_v41 = vld [vmem:[%s6558_s12 + $0x148] sm:$0xff]  ;;  %v5231_v42 = vld [vmem:[%s6558_s12 + $0x150] sm:$0xff] }
  0x16   :  { %6608 = vst [vmem:[#allocation49_spill] sm:$0xff] %v5221_v40  ;;  %6609 = vst [vmem:[#allocation50_spill] sm:$0xff] %v5226_v41  ;;  %v5236_v43 = vld [vmem:[%s6558_s12 + $0x158] sm:$0xff]  ;;  %v5241_v44 = vld [vmem:[%s6558_s12 + $0x160] sm:$0xff] }
  0x17   :  { %6610 = vst [vmem:[#allocation51_spill] sm:$0xff] %v5231_v42  ;;  %6611 = vst [vmem:[#allocation52_spill] sm:$0xff] %v5236_v43  ;;  %v5246_v45 = vld [vmem:[%s6558_s12 + $0x168] sm:$0xff]  ;;  %v5251_v46 = vld [vmem:[%s6558_s12 + $0x170] sm:$0xff] }
  0x18   :  { %6612 = vst [vmem:[#allocation53_spill] sm:$0xff] %v5241_v44  ;;  %6613 = vst [vmem:[#allocation54_spill] sm:$0xff] %v5246_v45  ;;  %v5256_v47 = vld [vmem:[%s6558_s12 + $0x178] sm:$0xff]  ;;  %v5261_v48 = vld [vmem:[%s6558_s12 + $0x180] sm:$0xff] }
  0x19   :  { %6614 = vst [vmem:[#allocation55_spill] sm:$0xff] %v5251_v46  ;;  %6615 = vst [vmem:[#allocation56_spill] sm:$0xff] %v5256_v47  ;;  %v5266_v49 = vld [vmem:[%s6558_s12 + $0x188] sm:$0xff]  ;;  %v5271_v50 = vld [vmem:[%s6558_s12 + $0x190] sm:$0xff] }
  0x1a   :  { %6616 = vst [vmem:[#allocation57_spill] sm:$0xff] %v5261_v48  ;;  %6617 = vst [vmem:[#allocation58_spill] sm:$0xff] %v5266_v49  ;;  %v5276_v51 = vld [vmem:[%s6558_s12 + $0x198] sm:$0xff]  ;;  %v5281_v52 = vld [vmem:[%s6558_s12 + $0x1a0] sm:$0xff] }
  0x1b   :  { %6618 = vst [vmem:[#allocation59_spill] sm:$0xff] %v5271_v50  ;;  %6619 = vst [vmem:[#allocation60_spill] sm:$0xff] %v5276_v51  ;;  %v5286_v53 = vld [vmem:[%s6558_s12 + $0x1a8] sm:$0xff]  ;;  %v5291_v54 = vld [vmem:[%s6558_s12 + $0x1b0] sm:$0xff] }
  0x1c   :  { %6620 = vst [vmem:[#allocation61_spill] sm:$0xff] %v5281_v52  ;;  %6621 = vst [vmem:[#allocation62_spill] sm:$0xff] %v5286_v53  ;;  %v5296_v55 = vld [vmem:[%s6558_s12 + $0x1b8] sm:$0xff]  ;;  %v5301_v56 = vld [vmem:[%s6558_s12 + $0x1c0] sm:$0xff] }
  0x1d   :  { %6622 = vst [vmem:[#allocation63_spill] sm:$0xff] %v5291_v54  ;;  %6623 = vst [vmem:[#allocation64_spill] sm:$0xff] %v5296_v55  ;;  %v5306_v57 = vld [vmem:[%s6558_s12 + $0x1c8] sm:$0xff]  ;;  %v5311_v58 = vld [vmem:[%s6558_s12 + $0x1d0] sm:$0xff] }
  0x1e   :  { %6624 = vst [vmem:[#allocation65_spill] sm:$0xff] %v5301_v56  ;;  %6625 = vst [vmem:[#allocation66_spill] sm:$0xff] %v5306_v57  ;;  %v5316_v59 = vld [vmem:[%s6558_s12 + $0x1d8] sm:$0xff]  ;;  %v5321_v60 = vld [vmem:[%s6558_s12 + $0x1e0] sm:$0xff] }
  0x1f   :  { %6626 = vst [vmem:[#allocation67_spill] sm:$0xff] %v5311_v58  ;;  %6627 = vst [vmem:[#allocation68_spill] sm:$0xff] %v5316_v59  ;;  %v5326_v61 = vld [vmem:[%s6558_s12 + $0x1e8] sm:$0xff]  ;;  %v5331_v62 = vld [vmem:[%s6558_s12 + $0x1f0] sm:$0xff] }
  0x20   :  { %6628 = vst [vmem:[#allocation69_spill] sm:$0xff] %v5321_v60  ;;  %6629 = vst [vmem:[#allocation70_spill] sm:$0xff] %v5326_v61  ;;  %v5336_v63 = vld [vmem:[%s6558_s12 + $0x1f8] sm:$0xff]  ;;  %v5341_v59 = vld [vmem:[%s6558_s12 + $0x200] sm:$0xff] }
  0x21   :  { %6630 = vst [vmem:[#allocation71_spill] sm:$0xff] %v5331_v62  ;;  %6631 = vst [vmem:[#allocation72_spill] sm:$0xff] %v5336_v63  ;;  %v5346_v60 = vld [vmem:[%s6558_s12 + $0x208] sm:$0xff]  ;;  %v5351_v61 = vld [vmem:[%s6558_s12 + $0x210] sm:$0xff] }
  0x22   :  { %6632 = vst [vmem:[#allocation73_spill] sm:$0xff] %v5341_v59  ;;  %6633 = vst [vmem:[#allocation74_spill] sm:$0xff] %v5346_v60  ;;  %v5356_v62 = vld [vmem:[%s6558_s12 + $0x218] sm:$0xff]  ;;  %v5361_v63 = vld [vmem:[%s6558_s12 + $0x220] sm:$0xff] }
  0x23   :  { %6634 = vst [vmem:[#allocation75_spill] sm:$0xff] %v5351_v61  ;;  %6635 = vst [vmem:[#allocation76_spill] sm:$0xff] %v5356_v62  ;;  %v5366_v58 = vld [vmem:[%s6558_s12 + $0x228] sm:$0xff]  ;;  %v5371_v57 = vld [vmem:[%s6558_s12 + $0x230] sm:$0xff] }
  0x24   :  { %6636 = vst [vmem:[#allocation77_spill] sm:$0xff] %v5361_v63  ;;  %6637 = vst [vmem:[#allocation78_spill] sm:$0xff] %v5366_v58  ;;  %v5376_v56 = vld [vmem:[%s6558_s12 + $0x238] sm:$0xff]  ;;  %v5381_v47 = vld [vmem:[%s6558_s12 + $0x240] sm:$0xff] }
  0x25   :  { %6638 = vst [vmem:[#allocation79_spill] sm:$0xff] %v5371_v57  ;;  %6639 = vst [vmem:[#allocation80_spill] sm:$0xff] %v5376_v56  ;;  %v5386_v46 = vld [vmem:[%s6558_s12 + $0x248] sm:$0xff]  ;;  %v5391_v58 = vld [vmem:[%s6558_s12 + $0x250] sm:$0xff] }
  0x26   :  { %6640 = vst [vmem:[#allocation81_spill] sm:$0xff] %v5381_v47  ;;  %6641 = vst [vmem:[#allocation82_spill] sm:$0xff] %v5386_v46  ;;  %v5396_v57 = vld [vmem:[%s6558_s12 + $0x258] sm:$0xff]  ;;  %v5401_v56 = vld [vmem:[%s6558_s12 + $0x260] sm:$0xff] }
  0x27   :  { %6642 = vst [vmem:[#allocation83_spill] sm:$0xff] %v5391_v58  ;;  %6643 = vst [vmem:[#allocation84_spill] sm:$0xff] %v5396_v57  ;;  %v5406_v47 = vld [vmem:[%s6558_s12 + $0x268] sm:$0xff]  ;;  %v5411_v46 = vld [vmem:[%s6558_s12 + $0x270] sm:$0xff] }
  0x28   :  { %6644 = vst [vmem:[#allocation85_spill] sm:$0xff] %v5401_v56  ;;  %6645 = vst [vmem:[#allocation86_spill] sm:$0xff] %v5406_v47  ;;  %v5416_v58 = vld [vmem:[%s6558_s12 + $0x278] sm:$0xff] }
  0x29   :  { %6646 = vst [vmem:[#allocation87_spill] sm:$0xff] %v5411_v46  ;;  %6647 = vst [vmem:[#allocation88_spill] sm:$0xff] %v5416_v58 }
  0x2a   :  { %246 = vsyncadd [#allocation3], 10240  ;;  %v5421_v56 = vld [vmem:[%s6547_s1 + $0x4] ss:$36 sps:$4 sm:$0xff]   ;;  %v6561_v57 = vmov 0   ;;  %v6648_v28 = vmov 0  }
  0x2b   :  { %v5426_v47 = vld [vmem:[%s6547_s1] ss:$36 sps:$4 sm:$0xff]   ;;  %748 = vmatprep.mubr.bf16.mxu0 %v6561_v57  ;;  %801 = vmatprep.mubr.bf16.mxu1 %v6561_v57  ;;  %v5433_v58 = vld [vmem:[%s6547_s1 + $0x4c] ss:$36 sps:$4 sm:$0xff]   ;;  %v5448_v45 = vld [vmem:[%s6547_s1 + $0x94] ss:$36 sps:$4 sm:$0xff]  }
  0x2c   :  { %4725 = vset.pattern.permute.xlu0 %v6561_v57  ;;  %4726 = vset.pattern.permute.xlu1 %v6561_v57  ;;  %v5442_v46 = vld [vmem:[%s6547_s1 + $0x48] ss:$36 sps:$4 sm:$0xff]   ;;  %v5453_v57 = vld [vmem:[%s6547_s1 + $0x90] ss:$36 sps:$4 sm:$0xff]   ;;  %v5463_v44 = vld [vmem:[%s6547_s1 + $0xdc] ss:$36 sps:$4 sm:$0xff]  }
  0x2d   :  { %716 = vmatprep.subr.bf16.mxu0 %v5421_v56  ;;  %v4744_v63 = vld [vmem:[%s6547_s1 + $0xc] ss:$36 sps:$4 sm:$0xff]   ;;  %v5471_v43 = vld [vmem:[%s6547_s1 + $0xd8] ss:$36 sps:$4 sm:$0xff]   ;;  %v5564_v53 = vld [vmem:[%s6546_s0] sm:$0xff]   ;;  %vm1013_vm0 = vcmask 261120  }
  0x2e   :  { %717 = vmatpush1.bf16.msra.mxu0 %v5426_v47  ;;  %v4747_v62 = vld [vmem:[%s6547_s1 + $0x8] ss:$36 sps:$4 sm:$0xff]   ;;  %769 = vmatprep.subr.bf16.mxu1 %v4744_v63  ;;  %v4750_v61 = vld [vmem:[%s6547_s1 + $0x54] ss:$36 sps:$4 sm:$0xff]   ;;  %v4756_v60 = vld [vmem:[%s6547_s1 + $0x9c] ss:$36 sps:$4 sm:$0xff]  }
  0x2f   :  { %718 = vmatprep.subr.bf16.mxu0 %v5433_v58  ;;  %770 = vmatpush1.bf16.msra.mxu1 %v4747_v62  ;;  %v4753_v42 = vld [vmem:[%s6547_s1 + $0x50] ss:$36 sps:$4 sm:$0xff]   ;;  %v5484_v63 = vld [vmem:[%s6547_s1 + $0x124] ss:$36 sps:$4 sm:$0xff]   ;;  %v4759_v41 = vld [vmem:[%s6547_s1 + $0x98] ss:$36 sps:$4 sm:$0xff]  }
  0x30   :  { %771 = vmatprep.subr.bf16.mxu1 %v4750_v61  ;;  %v5489_v62 = vld [vmem:[%s6547_s1 + $0x120] ss:$36 sps:$4 sm:$0xff]   ;;  %v5505_v59 = vld [vmem:[%s6547_s1 + $0x16c] ss:$36 sps:$4 sm:$0xff]   ;;  %v4768_v31 = vld [vmem:[%s6547_s1 + $0x174] ss:$36 sps:$4 sm:$0xff]  }
  0x31   :  { %v4761_v61 = vld [vmem:[%s6547_s1 + $0xe4] ss:$36 sps:$4 sm:$0xff]   ;;  %v4764_v40 = vld [vmem:[%s6547_s1 + $0x12c] ss:$36 sps:$4 sm:$0xff]   ;;  %v5541_v54 = vld [vmem:[%s6547_s1 + $0x1fc] ss:$36 sps:$4 sm:$0xff]  }
  0x32   :  { %719 = vmatpush1.bf16.msra.mxu0 %v5442_v46  ;;  %v5528_v55 = vld [vmem:[%s6547_s1 + $0x1b0] ss:$36 sps:$4 sm:$0xff]   ;;  %v4771_v30 = vld [vmem:[%s6547_s1 + $0x1bc] ss:$36 sps:$4 sm:$0xff]   ;;  %v4777_v52 = vld [vmem:[%s6547_s1 + $0x204] ss:$36 sps:$4 sm:$0xff]  }
  0x33   :  { %720 = vmatprep.subr.bf16.mxu0 %v5448_v45  ;;  %772 = vmatpush1.bf16.msra.mxu1 %v4753_v42  ;;  %v4763_v42 = vld [vmem:[%s6547_s1 + $0xe0] ss:$36 sps:$4 sm:$0xff]   ;;  %v5573_v29 = vld [vmem:[%s6547_s1 + $0x10] ss:$36 sps:$4 sm:$0xff]   ;;  %v5593_v51 = vld [vmem:[%s6547_s1 + $0x58] ss:$36 sps:$4 sm:$0xff]  }
  0x34   :  { %773 = vmatprep.subr.bf16.mxu1 %v4756_v60  ;;  %v5514_v60 = vld [vmem:[%s6547_s1 + $0x168] ss:$36 sps:$4 sm:$0xff]   ;;  %v4800_v27 = vld [vmem:[%s6547_s1 + $0x1c] ss:$36 sps:$4 sm:$0xff]   ;;  %v5643_v48 = vld [vmem:[%s6547_s1 + $0x134] ss:$36 sps:$4 sm:$0xff]  }
  0x35   :  { %v5607_v50 = vld [vmem:[%s6546_s0 + $0x8] sm:$0xff]   ;;  %v5612_v26 = vld [vmem:[%s6547_s1 + $0xa0] ss:$36 sps:$4 sm:$0xff]   ;;  %v4798_v49 = vld [vmem:[%s6547_s1 + $0x18] ss:$36 sps:$4 sm:$0xff]  }
  0x36   :  { %721 = vmatpush1.bf16.msra.mxu0 %v5453_v57  ;;  %v5632_v25 = vld [vmem:[%s6547_s1 + $0xe8] ss:$36 sps:$4 sm:$0xff]   ;;  %v5657_v39 = vld [vmem:[%s6547_s1 + $0x17c] ss:$36 sps:$4 sm:$0xff]   ;;  %v4812_v7 = vld [vmem:[%s6547_s1 + $0xf4] ss:$36 sps:$4 sm:$0xff]  }
  0x37   :  { %722 = vmatprep.subr.bf16.mxu0 %v5463_v44  ;;  %774 = vmatpush1.bf16.msra.mxu1 %v4759_v41  ;;  %v5523_v41 = vld [vmem:[%s6547_s1 + $0x1b4] ss:$36 sps:$4 sm:$0xff]   ;;  %v4809_v24 = vld [vmem:[%s6547_s1 + $0xac] ss:$36 sps:$4 sm:$0xff]   ;;  %v4815_v6 = vld [vmem:[%s6547_s1 + $0x13c] ss:$36 sps:$4 sm:$0xff]  }
  0x38   :  { %775 = vmatprep.subr.bf16.mxu1 %v4761_v61  ;;  %v4766_v61 = vld [vmem:[%s6547_s1 + $0x128] ss:$36 sps:$4 sm:$0xff]   ;;  %v5671_v38 = vld [vmem:[%s6547_s1 + $0x178] ss:$36 sps:$4 sm:$0xff]   ;;  %v5690_v37 = vld [vmem:[%s6547_s1 + $0x1c0] ss:$36 sps:$4 sm:$0xff]  }
  0x39   :  { %v5695_v5 = vld [vmem:[%s6547_s1 + $0x138] ss:$36 sps:$4 sm:$0xff]   ;;  %v5705_v36 = vld [vmem:[%s6547_s1 + $0x184] ss:$36 sps:$4 sm:$0xff]   ;;  %v5722_v35 = vld [vmem:[%s6547_s1 + $0x1cc] ss:$36 sps:$4 sm:$0xff]  }
  0x3a   :  { %723 = vmatpush1.bf16.msra.mxu0 %v5471_v43  ;;  %v5717_v4 = vld [vmem:[%s6547_s1 + $0x180] ss:$36 sps:$4 sm:$0xff]   ;;  %6650 = vst [vmem:[#allocation90_spill] sm:$0xff] %v5722_v35  ;;  %v5741_v3 = vld [vmem:[%s6547_s1 + $0x214] ss:$36 sps:$4 sm:$0xff]  }
  0x3b   :  { %724 = vmatprep.subr.bf16.mxu0 %v5484_v63  ;;  %776 = vmatpush1.bf16.msra.mxu1 %v4763_v42  ;;  %v4770_v42 = vld [vmem:[%s6547_s1 + $0x170] ss:$36 sps:$4 sm:$0xff]   ;;  %6649 = vst [vmem:[#allocation89_spill] sm:$0xff] %v5717_v4  ;;  %6652 = vst [vmem:[#allocation92_spill] sm:$0xff] %v5741_v3  ;;  %v5748_v34 = vld [vmem:[%s6547_s1 + $0x68] ss:$36 sps:$4 sm:$0xff]  }
  0x3c   :  { %777 = vmatprep.subr.bf16.mxu1 %v4764_v40  ;;  %v5550_v40 = vld [vmem:[%s6547_s1 + $0x1f8] ss:$36 sps:$4 sm:$0xff]   ;;  %v5755_v2 = vld [vmem:[%s6547_s1 + $0x210] ss:$36 sps:$4 sm:$0xff]   ;;  %v5785_v32 = vld [vmem:[%s6547_s1 + $0x140] ss:$36 sps:$4 sm:$0xff]  }
  0x3d   :  { %6653 = vst [vmem:[#allocation93_spill] sm:$0xff] %v5755_v2  ;;  %v5763_v33 = vld [vmem:[%s6547_s1 + $0xb0] ss:$36 sps:$4 sm:$0xff]   ;;  %v5772_v1 = vld [vmem:[%s6547_s1 + $0xf8] ss:$36 sps:$4 sm:$0xff]   ;;  %v1645_v22 = vld [vmem:[%s6551_s5] sm:$0xff] }
  0x3e   :  { %725 = vmatpush1.bf16.msra.mxu0 %v5489_v62  ;;  %v5792_v0 = vld [vmem:[%s6547_s1 + $0x188] ss:$36 sps:$4 sm:$0xff]   ;;  %v5807_v23 = vld [vmem:[%s6547_s1 + $0x218] ss:$36 sps:$4 sm:$0xff]   ;;  %v4833_v15 = vld [vmem:[%s6550_s4 + $0x10] sm:$0xff]   ;;  %1651 = vperm.xlu0 %4725, %v1645_v22  }
  0x3f   :  { %726 = vmatprep.subr.bf16.mxu0 %v5505_v59  ;;  %778 = vmatpush1.bf16.msra.mxu1 %v4766_v61  ;;  %v5559_v61 = vld [vmem:[%s6547_s1 + $0x14] ss:$36 sps:$4 sm:$0xff]  }
  0x40   :  { %779 = vmatprep.subr.bf16.mxu1 %v4768_v31  ;;  %v4776_v31 = vld [vmem:[%s6547_s1 + $0x1b8] ss:$36 sps:$4 sm:$0xff]   ;;  %v1647_v14 = vld [vmem:[%s6551_s5 + $0x10] sm:$0xff] }
  0x41   :  { %1661 = vperm.xlu1 %4726, %v1647_v14   ;;  %v1648_v21 = vld [vmem:[%s6551_s5 + $0x18] sm:$0xff] }
  0x42   :  { %727 = vmatpush1.bf16.msra.mxu0 %v5514_v60 }
  0x43   :  { %728 = vmatprep.subr.bf16.mxu0 %v5523_v41  ;;  %780 = vmatpush1.bf16.msra.mxu1 %v4770_v42  ;;  %v5582_v42 = vld [vmem:[%s6547_s1 + $0x5c] ss:$36 sps:$4 sm:$0xff]  }
  0x44   :  { %781 = vmatprep.subr.bf16.mxu1 %v4771_v30  ;;  %v4782_v30 = vld [vmem:[%s6547_s1 + $0x200] ss:$36 sps:$4 sm:$0xff]  }
  0x45   :  { %1666 = vperm.xlu1 %4726, %v1648_v21  }
  0x46   :  { %729 = vmatpush1.bf16.msra.mxu0 %v5528_v55 }
  0x47   :  { %730 = vmatprep.subr.bf16.mxu0 %v5541_v54  ;;  %782 = vmatpush1.bf16.msra.mxu1 %v4776_v31  ;;  %v5602_v31 = vld [vmem:[%s6547_s1 + $0xa4] ss:$36 sps:$4 sm:$0xff]  }
  0x48   :  { %783 = vmatprep.subr.bf16.mxu1 %v4777_v52  ;;  %v5618_v52 = vld [vmem:[%s6547_s1 + $0xec] ss:$36 sps:$4 sm:$0xff]  }
  0x4a   :  { %731 = vmatpush1.bf16.msra.mxu0 %v5550_v40 }
  0x4b   :  { %822 = vmatprep.subr.bf16.mxu0 %v5559_v61  ;;  %784 = vmatpush1.bf16.msra.mxu1 %v4782_v30  ;;  %v4806_v30 = vld [vmem:[%s6547_s1 + $0x64] ss:$36 sps:$4 sm:$0xff]  }
  0x4c   :  { %875 = vmatprep.subr.bf16.mxu1 %v4800_v27  ;;  %v4804_v27 = vld [vmem:[%s6547_s1 + $0x60] ss:$36 sps:$4 sm:$0xff]  }
  0x4d   :  { %749 = vmatmul.mubr.bf16.vlgmr.msra.gmra.mrb[0].mxu0 %v5564_v53 }
  0x4e   :  { %758 = vmatprep.mubr.bf16.mxu0 %v6648_v28  ;;  %823 = vmatpush1.bf16.msra.mxu0 %v5573_v29 }
  0x4f   :  { %824 = vmatprep.subr.bf16.mxu0 %v5582_v42  ;;  %802 = vmatmul.mubr.bf16.vlgmr.msra.gmra.mrb[0].mxu1 %v5564_v53 }
  0x50   :  { %811 = vmatprep.mubr.bf16.mxu1 %v6648_v28  ;;  %876 = vmatpush1.bf16.msra.mxu1 %v4798_v49  ;;  %v5651_v49 = vld [vmem:[%s6547_s1 + $0x130] ss:$36 sps:$4 sm:$0xff]  }
  0x51   :  { %877 = vmatprep.subr.bf16.mxu1 %v4806_v30  ;;  %v4807_v30 = vld [vmem:[%s6547_s1 + $0xa8] ss:$36 sps:$4 sm:$0xff]  }
  0x52   :  { %825 = vmatpush1.bf16.msra.mxu0 %v5593_v51 }
  0x53   :  { %826 = vmatprep.subr.bf16.mxu0 %v5602_v31 }
  0x54   :  { %878 = vmatpush1.bf16.msra.mxu1 %v4804_v27  ;;  %v5676_v27 = vld [vmem:[%s6547_s1 + $0x1c4] ss:$36 sps:$4 sm:$0xff]  }
  0x55   :  { %759 = vmatmul.mubr.bf16.gmra.mrb[4].mxu0 %v5607_v50  ;;  %879 = vmatprep.subr.bf16.mxu1 %v4809_v24  ;;  %v4810_v24 = vld [vmem:[%s6547_s1 + $0xf0] ss:$36 sps:$4 sm:$0xff]  }
  0x56   :  { %827 = vmatpush1.bf16.msra.mxu0 %v5612_v26  ;;  %854 = vmatprep.mubr.bf16.mxu0 %v6648_v28 }
  0x57   :  { %828 = vmatprep.subr.bf16.mxu0 %v5618_v52  ;;  %812 = vmatmul.mubr.bf16.gmra.mrb[4].mxu1 %v5607_v50 }
  0x58   :  { %907 = vmatprep.mubr.bf16.mxu1 %v6648_v28  ;;  %880 = vmatpush1.bf16.msra.mxu1 %v4807_v30  ;;  %v5700_v30 = vld [vmem:[%s6547_s1 + $0x20c] ss:$36 sps:$4 sm:$0xff]  }
  0x59   :  { %881 = vmatprep.subr.bf16.mxu1 %v4812_v7  ;;  %v5712_v7 = vld [vmem:[%s6547_s1 + $0x208] ss:$36 sps:$4 sm:$0xff]  }
  0x5a   :  { %829 = vmatpush1.bf16.msra.mxu0 %v5632_v25 }
  0x5b   :  { %830 = vmatprep.subr.bf16.mxu0 %v5643_v48 }
  0x5c   :  { %882 = vmatpush1.bf16.msra.mxu1 %v4810_v24  ;;  %v5727_v24 = vld [vmem:[%s6547_s1 + $0x20] ss:$36 sps:$4 sm:$0xff]  }
  0x5d   :  { %883 = vmatprep.subr.bf16.mxu1 %v4815_v6  ;;  %v5736_v6 = vld [vmem:[%s6547_s1 + $0x1c8] ss:$36 sps:$4 sm:$0xff]  }
  0x5e   :  { %831 = vmatpush1.bf16.msra.mxu0 %v5651_v49  ;;  %6651 = vst [vmem:[#allocation91_spill] sm:$0xff] %v5736_v6 }
  0x5f   :  { %832 = vmatprep.subr.bf16.mxu0 %v5657_v39 }
  0x60   :  { %884 = vmatpush1.bf16.msra.mxu1 %v5695_v5 }
  0x61   :  { %885 = vmatprep.subr.bf16.mxu1 %v5705_v36 }
  0x62   :  { %833 = vmatpush1.bf16.msra.mxu0 %v5671_v38 }
  0x63   :  { %834 = vmatprep.subr.bf16.mxu0 %v5676_v27 }
  0x64   :  { %886 = vmatpush1.bf16.msra.mxu1 %v5717_v4 }
  0x65   :  { %887 = vmatprep.subr.bf16.mxu1 %v5722_v35 }
  0x66   :  { %835 = vmatpush1.bf16.msra.mxu0 %v5690_v37 }
  0x67   :  { %836 = vmatprep.subr.bf16.mxu0 %v5700_v30 }
  0x68   :  { %888 = vmatpush1.bf16.msra.mxu1 %v5736_v6 }
  0x69   :  { %889 = vmatprep.subr.bf16.mxu1 %v5741_v3 }
  0x6a   :  { %837 = vmatpush1.bf16.msra.mxu0 %v5712_v7 }
  0x6b   :  { %4183 = vmatprep.subr.bf16.mxu0 %v5727_v24 }
  0x6c   :  { %890 = vmatpush1.bf16.msra.mxu1 %v5755_v2 }
  0x6d   :  { %855 = vmatmul.mubr.bf16.vlgmr.msra.gmra.mrb[8].mxu0 %v5564_v53 }
  0x6e   :  { %864 = vmatprep.mubr.bf16.mxu0 %v6648_v28  ;;  %4184 = vmatpush3.bf16.msra.mxu0 %v5727_v24 }
  0x6f   :  { %4185 = vmatprep.subr.bf16.mxu0 %v5748_v34  ;;  %908 = vmatmul.mubr.bf16.vlgmr.msra.gmra.mrb[8].mxu1 %v5564_v53 }
  0x70   :  { %917 = vmatprep.mubr.bf16.mxu1 %v6648_v28 }
  0x72   :  { %4186 = vmatpush3.bf16.msra.mxu0 %v5748_v34 }
  0x73   :  { %4187 = vmatprep.subr.bf16.mxu0 %v5763_v33 }
  0x75   :  { %865 = vmatmul.mubr.bf16.gmra.mrb[12].mxu0 %v5607_v50 }
  0x76   :  { %4199 = vmatprep.mubr.bf16.mxu0 %v5564_v53  ;;  %4188 = vmatpush3.bf16.msra.mxu0 %v5763_v33  ;;  %v5800_v53 = vld [vmem:[%s6547_s1 + $0x1d0] ss:$36 sps:$4 sm:$0xff]  }
  0x77   :  { %4189 = vmatprep.subr.bf16.mxu0 %v5772_v1  ;;  %918 = vmatmul.mubr.bf16.gmra.mrb[12].mxu1 %v5607_v50 }
  0x78   :  { %4207 = vmatprep.mubr.msk.bf16.mxu1 %vm1013_vm0, %v4833_v15 }
  0x7a   :  { %4190 = vmatpush3.bf16.msra.mxu0 %v5772_v1 }
  0x7b   :  { %4191 = vmatprep.subr.bf16.mxu0 %v5785_v32 }
  0x7e   :  { %4192 = vmatpush3.bf16.msra.mxu0 %v5785_v32 }
  0x7f   :  { %4193 = vmatprep.subr.bf16.mxu0 %v5792_v0 }
  0x82   :  { %4194 = vmatpush3.bf16.msra.mxu0 %v5792_v0 }
  0x83   :  { %4195 = vmatprep.subr.bf16.mxu0 %v5800_v53 }
  0x86   :  { %4196 = vmatpush3.bf16.msra.mxu0 %v5800_v53 }
  0x87   :  { %4197 = vmatprep.subr.bf16.mxu0 %v5807_v23 }
  0x8a   :  { %4198 = vmatpush3.bf16.msra.mxu0 %v5807_v23 }
  0x8d   :  { %4200 = vmatmul.mubr.bf16.vlgmr.msra.gmra.mrb[16].mxu0 %v5607_v50  ;;  %v1646_v50 = vld [vmem:[%s6551_s5 + $0x8] sm:$0xff] }
  0x8e   :  { %1656 = vperm.xlu0 %4725, %v1646_v50  }
 0x120   :  { %v750_v15 = vpop.f32.mrb[0].mxu0 }
 0x121   :  { %v752_v13 = vpop.f32.mrb[1].mxu0 }
 0x122   :  { %v754_v20 = vpop.f32.mrb[2].mxu0  ;;  %v803_v22 = vpop.f32.mrb[0].mxu1 }
 0x123   :  { %v977_v12 = vpack.c.bf16 %v754_v20, %v750_v15  ;;  %v756_v19 = vpop.f32.mrb[3].mxu0  ;;  %v805_v18 = vpop.f32.mrb[1].mxu1  ;;  %v4834_v20 = vld [vmem:[%s6550_s4 + $0x18] sm:$0xff]  }
 0x124   :  { %v978_v11 = vpack.c.bf16 %v756_v19, %v752_v13  ;;  %v807_v17 = vpop.f32.mrb[2].mxu1 }
 0x125   :  { %v979_v16 = vpack.c.bf16 %v807_v17, %v803_v22  ;;  %v809_v8 = vpop.f32.mrb[3].mxu1 }
 0x126   :  { %4203 = vmatprep.subr.bf16.mxu1 %v978_v11  ;;  %v980_v50 = vpack.c.bf16 %v809_v8, %v805_v18  ;;  %v4836_v8 = vld [vmem:[%s6550_s4 + $0x8] sm:$0xff]  }
 0x127   :  { %4204 = vmatpush3.bf16.msra.mxu1 %v978_v11  ;;  %v4835_v11 = vld [vmem:[%s6550_s4] sm:$0xff]  }
 0x128   :  { %v760_v14 = vpop.f32.mrb[4].mxu0 }
 0x129   :  { %v762_v10 = vpop.f32.mrb[5].mxu0 }
 0x12a   :  { %v764_v9 = vpop.f32.mrb[6].mxu0  ;;  %v813_v13 = vpop.f32.mrb[4].mxu1 }
 0x12b   :  { %v986_v2 = vpack.c.bf16 %v764_v9, %v760_v14  ;;  %v766_v3 = vpop.f32.mrb[7].mxu0  ;;  %v815_v19 = vpop.f32.mrb[5].mxu1 }
 0x12c   :  { %v987_v21 = vpack.c.bf16 %v766_v3, %v762_v10  ;;  %v817_v15 = vpop.f32.mrb[6].mxu1  ;;  %v4837_v10 = vld [vmem:[%s6550_s4 + $0x20] sm:$0xff]  }
 0x12d   :  { %v988_v9 = vpack.c.bf16 %v817_v15, %v813_v13  ;;  %v819_v17 = vpop.f32.mrb[7].mxu1  ;;  %v4839_v13 = vld [vmem:[%s6550_s4 + $0x30] sm:$0xff]  }
 0x12e   :  { %4205 = vmatprep.subr.bf16.mxu1 %v987_v21  ;;  %v989_v3 = vpack.c.bf16 %v819_v17, %v815_v19 }
 0x12f   :  { %4206 = vmatpush3.bf16.msra.mxu1 %v987_v21 }
 0x130   :  { %4211 = vmatprep.subr.bf16.mxu1 %v977_v12 }
 0x132   :  { %4208 = vmatmul.mubr.msk.bf16.vlgmr.msra.gmra.mrb[16].mxu1 %vm1013_vm0, %v4834_v20  ;;  %v4838_v20 = vld [vmem:[%s6550_s4 + $0x28] sm:$0xff]  }
 0x133   :  { %4212 = vmatpush3.bf16.msra.mxu1 %v977_v12  ;;  %4215 = vmatprep.mubr.msk.bf16.mxu1 %vm1013_vm0, %v4835_v11 }
 0x134   :  { %4213 = vmatprep.subr.bf16.mxu1 %v986_v2 }
 0x137   :  { %4214 = vmatpush3.bf16.msra.mxu1 %v986_v2 }
 0x138   :  { %4219 = vmatprep.subr.bf16.mxu1 %v979_v16 }
 0x13e   :  { %4216 = vmatmul.mubr.msk.bf16.vlgmr.msra.gmra.mrb[16].mxu1 %vm1013_vm0, %v4836_v8 }
 0x13f   :  { %4220 = vmatpush3.bf16.msra.mxu1 %v979_v16  ;;  %4223 = vmatprep.mubr.msk.bf16.mxu1 %vm1013_vm0, %v4837_v10 }
 0x140   :  { %4221 = vmatprep.subr.bf16.mxu1 %v988_v9  ;;  %v856_v12 = vpop.f32.mrb[8].mxu0 }
 0x141   :  { %v858_v18 = vpop.f32.mrb[9].mxu0 }
 0x142   :  { %v860_v22 = vpop.f32.mrb[10].mxu0  ;;  %v909_v11 = vpop.f32.mrb[8].mxu1 }
 0x143   :  { %4222 = vmatpush3.bf16.msra.mxu1 %v988_v9  ;;  %v981_v2 = vpack.c.bf16 %v860_v22, %v856_v12  ;;  %v862_v14 = vpop.f32.mrb[11].mxu0  ;;  %v911_v15 = vpop.f32.mrb[9].mxu1 }
 0x144   :  { %4227 = vmatprep.subr.bf16.mxu1 %v980_v50  ;;  %v982_v21 = vpack.c.bf16 %v862_v14, %v858_v18  ;;  %v913_v9 = vpop.f32.mrb[10].mxu1 }
 0x145   :  { %v983_v12 = vpack.c.bf16 %v913_v9, %v909_v11  ;;  %v915_v18 = vpop.f32.mrb[11].mxu1  ;;  %v4844_v9 = vld [vmem:[%s6550_s4 + $0x58] sm:$0xff]  }
 0x146   :  { %v984_v14 = vpack.c.bf16 %v915_v18, %v911_v15  ;;  %v4849_v18 = vld [vmem:[%s6550_s4 + $0x80] sm:$0xff]  }
 0x148   :  { %v866_v16 = vpop.f32.mrb[12].mxu0 }
 0x149   :  { %v868_v19 = vpop.f32.mrb[13].mxu0 }
 0x14a   :  { %4224 = vmatmul.mubr.msk.bf16.vlgmr.msra.gmra.mrb[16].mxu1 %vm1013_vm0, %v4838_v20  ;;  %v870_v17 = vpop.f32.mrb[14].mxu0  ;;  %v919_v6 = vpop.f32.mrb[12].mxu1  ;;  %v4840_v20 = vld [vmem:[%s6550_s4 + $0x38] sm:$0xff]  }
 0x14b   :  { %4228 = vmatpush3.bf16.msra.mxu1 %v980_v50  ;;  %4231 = vmatprep.mubr.msk.bf16.mxu1 %vm1013_vm0, %v4839_v13  ;;  %v990_v8 = vpack.c.bf16 %v870_v17, %v866_v16  ;;  %v872_v10 = vpop.f32.mrb[15].mxu0  ;;  %v921_v35 = vpop.f32.mrb[13].mxu1  ;;  %v4841_v50 = vld [vmem:[%s6550_s4 + $0x40] sm:$0xff]  }
 0x14c   :  { %4229 = vmatprep.subr.bf16.mxu1 %v989_v3  ;;  %v991_v22 = vpack.c.bf16 %v872_v10, %v868_v19  ;;  %v923_v4 = vpop.f32.mrb[14].mxu1  ;;  %v4843_v19 = vld [vmem:[%s6550_s4 + $0x50] sm:$0xff]  }
 0x14d   :  { %v992_v13 = vpack.c.bf16 %v923_v4, %v919_v6  ;;  %v925_v16 = vpop.f32.mrb[15].mxu1  ;;  %v4847_v10 = vld [vmem:[%s6550_s4 + $0x70] sm:$0xff]  }
 0x14e   :  { %v993_v11 = vpack.c.bf16 %v925_v16, %v921_v35  ;;  %v5909_v16 = vld [vmem:[%s6549_s3] ss:$0 sm:$0xff] }
 0x14f   :  { %4230 = vmatpush3.bf16.msra.mxu1 %v989_v3  ;;  %v4842_v3 = vld [vmem:[%s6550_s4 + $0x48] sm:$0xff]  }
 0x150   :  { %4235 = vmatprep.subr.bf16.mxu1 %v981_v2 }
 0x156   :  { %4232 = vmatmul.mubr.msk.bf16.vlgmr.msra.gmra.mrb[16].mxu1 %vm1013_vm0, %v4840_v20  ;;  %v1662_v20 = vpop.permute.xlu1 %1661 }
 0x157   :  { %4236 = vmatpush3.bf16.msra.mxu1 %v981_v2  ;;  %4239 = vmatprep.mubr.msk.bf16.mxu1 %vm1013_vm0, %v4841_v50  ;;  %v1652_v50 = vpop.permute.xlu0 %1651 }
 0x158   :  { %4237 = vmatprep.subr.bf16.mxu1 %v990_v8 }
 0x15b   :  { %4238 = vmatpush3.bf16.msra.mxu1 %v990_v8  ;;  %v4845_v8 = vld [vmem:[%s6550_s4 + $0x60] sm:$0xff]  }
 0x15c   :  { %4243 = vmatprep.subr.bf16.mxu1 %v982_v21 }
 0x160   :  { %v4201_v15 = vpop.f32.mrb[16].mxu0 }
 0x161   :  { %v962_v4 = vpop.f32.mrb[17].mxu0 }
 0x162   :  { %4240 = vmatmul.mubr.msk.bf16.vlgmr.msra.gmra.mrb[16].mxu1 %vm1013_vm0, %v4842_v3  ;;  %v4202_v35 = vpop.f32.mrb[18].mxu0 }
 0x163   :  { %4244 = vmatpush3.bf16.msra.mxu1 %v982_v21  ;;  %4247 = vmatprep.mubr.msk.bf16.mxu1 %vm1013_vm0, %v4843_v19  ;;  %v994_v6 = vpack.c.bf16 %v4202_v35, %v4201_v15  ;;  %v965_v2 = vpop.f32.mrb[19].mxu0  ;;  %v4846_v21 = vld [vmem:[%s6550_s4 + $0x68] sm:$0xff]   ;;  %v1675_v19 = vmul.f32 %v5909_v16, %v1652_v50  ;;  %v1677_v15 = vmul.f32 %v5909_v16, %v1662_v20 }
 0x164   :  { %4245 = vmatprep.subr.bf16.mxu1 %v991_v22  ;;  %v985_v17 = vpack.c.bf16 %v965_v2, %v962_v4 }
 0x167   :  { %4246 = vmatpush3.bf16.msra.mxu1 %v991_v22  ;;  %v4850_v22 = vld [vmem:[%s6550_s4 + $0x88] sm:$0xff]  }
 0x168   :  { %4251 = vmatprep.subr.bf16.mxu1 %v983_v12 }
 0x16e   :  { %4248 = vmatmul.mubr.msk.bf16.vlgmr.msra.gmra.mrb[16].mxu1 %vm1013_vm0, %v4844_v9 }
 0x16f   :  { %4252 = vmatpush3.bf16.msra.mxu1 %v983_v12  ;;  %4255 = vmatprep.mubr.msk.bf16.mxu1 %vm1013_vm0, %v4845_v8  ;;  %v4848_v12 = vld [vmem:[%s6550_s4 + $0x78] sm:$0xff]  }
 0x170   :  { %4253 = vmatprep.subr.bf16.mxu1 %v992_v13 }
 0x173   :  { %4254 = vmatpush3.bf16.msra.mxu1 %v992_v13  ;;  %v1667_v13 = vpop.permute.xlu1 %1666 }
 0x174   :  { %4259 = vmatprep.subr.bf16.mxu1 %v984_v14  ;;  %v1678_v3 = vmul.f32 %v5909_v16, %v1667_v13 }
 0x17a   :  { %4256 = vmatmul.mubr.msk.bf16.vlgmr.msra.gmra.mrb[16].mxu1 %vm1013_vm0, %v4846_v21 }
 0x17b   :  { %4260 = vmatpush3.bf16.msra.mxu1 %v984_v14  ;;  %4263 = vmatprep.mubr.msk.bf16.mxu1 %vm1013_vm0, %v4847_v10  ;;  %v5900_v14 = vld [vmem:[%s6548_s2] sm:$0xff] }
 0x17c   :  { %4261 = vmatprep.subr.bf16.mxu1 %v993_v11  ;;  %4297 = vmatprep.mubr.msk.f32.mxu0 %vm1013_vm0, %v5900_v14 }
 0x17f   :  { %4262 = vmatpush3.bf16.msra.mxu1 %v993_v11  ;;  %v1657_v11 = vpop.permute.xlu0 %1656 }
 0x180   :  { %4267 = vmatprep.subr.bf16.mxu1 %v985_v17 }
 0x186   :  { %4264 = vmatmul.mubr.msk.bf16.vlgmr.msra.gmra.mrb[16].mxu1 %vm1013_vm0, %v4848_v12 }
 0x187   :  { %4268 = vmatpush3.bf16.msra.mxu1 %v985_v17  ;;  %4271 = vmatprep.mubr.msk.bf16.mxu1 %vm1013_vm0, %v4849_v18 }
 0x188   :  { %4269 = vmatprep.subr.bf16.mxu1 %v994_v6 }
 0x18b   :  { %4270 = vmatpush3.bf16.msra.mxu1 %v994_v6  ;;  %v1676_v6 = vmul.f32 %v5909_v16, %v1657_v11 }
 0x192   :  { %4272 = vmatmul.mubr.msk.bf16.vlgmr.msra.gmra.mrb[16].mxu1 %vm1013_vm0, %v4850_v22 }
 0x193   :  { %4283 = vmatprep.mubr.msk.f32.mxu1 %vm1013_vm0, %v5900_v14 }
 0x265   :  { %v4273_v4 = vpop.f32.mrb[16].mxu1 }
 0x266   :  { %v1626_v35 = vpop.f32.mrb[17].mxu1  ;;  %v5919_v21 = vadd.f32 %v4273_v4, %v1677_v15  ;;  %v5943_v15 = vld [vmem:[%s6548_s2 + $0x10] sm:$0xff]  ;;  %v5954_v4 = vld [vmem:[%s6548_s2 + $0x18] sm:$0xff] }
 0x267   :  { %v5915_v2 = vadd.f32 %v1675_v19, %v1626_v35  ;;  %v4274_v17 = vpop.f32.mrb[18].mxu1  ;;  %v5938_v19 = vld [vmem:[%s6548_s2 + $0x8] sm:$0xff] }
 0x268   :  { %v5917_v9 = vadd.f32 %v4274_v17, %v1678_v3  ;;  %v1629_v8 = vpop.f32.mrb[19].mxu1  ;;  %v1790_v50 = vmul.f32 %v5919_v21, %v5919_v21 }
 0x269   :  { %v5921_v10 = vadd.f32 %v1676_v6, %v1629_v8  ;;  %v1788_v12 = vmul.f32 %v5915_v2, %v5915_v2 }
 0x26a   :  { %v1791_v18 = vmul.f32 %v5917_v9, %v5917_v9  ;;  %v4627_v13 = vpack.c.bf16 %v5917_v9, %v5919_v21 }
 0x26b   :  { %v1789_v22 = vmul.f32 %v5921_v10, %v5921_v10  ;;  %v4623_v20 = vpack.c.bf16 %v5921_v10, %v5915_v2 }
 0x26c   :  { %v4635_v3 = vpack.c.bf16 %v1791_v18, %v1790_v50  ;;  %v1902_v50 = vld [vmem:[%s6552_s6 + $0x8] sm:$0xff] }
 0x26d   :  { %4624 = vmatprep.subr.bf16.mxu1 %v4623_v20  ;;  %v4631_v11 = vpack.c.bf16 %v1789_v22, %v1788_v12  ;;  %v1901_v12 = vld [vmem:[%s6552_s6] sm:$0xff] }
 0x26e   :  { %4626 = vmatpush3.bf16.msra.mxu1 %v4623_v20 }
 0x26f   :  { %4628 = vmatprep.subr.bf16.mxu1 %v4627_v13  ;;  %4632 = vmatprep.subr.bf16.mxu0 %v4631_v11 }
 0x270   :  { %4634 = vmatpush3.bf16.msra.mxu0 %v4631_v11 }
 0x271   :  { %4636 = vmatprep.subr.bf16.mxu0 %v4635_v3 }
 0x272   :  { %4630 = vmatpush3.bf16.msra.mxu1 %v4627_v13  ;;  %v1917_v13 = vld [vmem:[%s6553_s7] sm:$0xff] }
 0x273   :  { %2093 = vmatprep.subr.bf16.mxu1 %v5559_v61 }
 0x274   :  { %4638 = vmatpush3.bf16.msra.mxu0 %v4635_v3  ;;  %v1903_v3 = vld [vmem:[%s6552_s6 + $0x10] sm:$0xff] }
 0x275   :  { %4284 = vmatmul.mubr.msk.f32.vlgmr.msra.gmra.mrb[20].mxu1 %vm1013_vm0, %v5938_v19  ;;  %1987 = vmatprep.subr.bf16.mxu0 %v5421_v56 }
 0x276   :  { %4286 = vmatprep.mubr.msk.f32.mxu1 %vm1013_vm0, %v5943_v15  ;;  %2094 = vmatpush1.bf16.msra.mxu1 %v5573_v29 }
 0x277   :  { %4298 = vmatmul.mubr.msk.f32.vlgmr.msra.gmra.mrb[20].mxu0 %vm1013_vm0, %v5938_v19  ;;  %2095 = vmatprep.subr.bf16.mxu1 %v5582_v42 }
 0x278   :  { %4300 = vmatprep.mubr.msk.f32.mxu0 %vm1013_vm0, %v5943_v15  ;;  %1988 = vmatpush1.bf16.msra.mxu0 %v5426_v47 }
 0x279   :  { %4287 = vmatmul.mubr.msk.f32.gmra.mrb[22].mxu1 %vm1013_vm0, %v5954_v4  ;;  %1989 = vmatprep.subr.bf16.mxu0 %v5433_v58 }
 0x27a   :  { %2096 = vmatpush1.bf16.msra.mxu1 %v5593_v51  ;;  %2125 = vmatprep.mubr.bf16.mxu1 %v6648_v28 }
 0x27b   :  { %4301 = vmatmul.mubr.msk.f32.gmra.mrb[22].mxu0 %vm1013_vm0, %v5954_v4  ;;  %2097 = vmatprep.subr.bf16.mxu1 %v5602_v31 }
 0x27c   :  { %1990 = vmatpush1.bf16.msra.mxu0 %v5442_v46  ;;  %2019 = vmatprep.mubr.bf16.mxu0 %v6648_v28 }
 0x27d   :  { %1991 = vmatprep.subr.bf16.mxu0 %v5448_v45 }
 0x27e   :  { %2098 = vmatpush1.bf16.msra.mxu1 %v5612_v26 }
 0x27f   :  { %2099 = vmatprep.subr.bf16.mxu1 %v5618_v52 }
 0x280   :  { %1992 = vmatpush1.bf16.msra.mxu0 %v5453_v57 }
 0x281   :  { %1993 = vmatprep.subr.bf16.mxu0 %v5463_v44 }
 0x282   :  { %2100 = vmatpush1.bf16.msra.mxu1 %v5632_v25  ;;  %v4887_v25 = vld [vmem:[%s6547_s1 + $0xc] ss:$36 sps:$4 sm:$0xff]  }
 0x283   :  { %2101 = vmatprep.subr.bf16.mxu1 %v5643_v48 }
 0x284   :  { %1994 = vmatpush1.bf16.msra.mxu0 %v5471_v43 }
 0x285   :  { %1995 = vmatprep.subr.bf16.mxu0 %v5484_v63 }
 0x286   :  { %2102 = vmatpush1.bf16.msra.mxu1 %v5651_v49 }
 0x287   :  { %2103 = vmatprep.subr.bf16.mxu1 %v5657_v39 }
 0x288   :  { %1996 = vmatpush1.bf16.msra.mxu0 %v5489_v62 }
 0x289   :  { %1997 = vmatprep.subr.bf16.mxu0 %v5505_v59 }
 0x28a   :  { %2104 = vmatpush1.bf16.msra.mxu1 %v5671_v38 }
 0x28b   :  { %2105 = vmatprep.subr.bf16.mxu1 %v5676_v27 }
 0x28c   :  { %1998 = vmatpush1.bf16.msra.mxu0 %v5514_v60 }
 0x28d   :  { %1999 = vmatprep.subr.bf16.mxu0 %v5523_v41 }
 0x28e   :  { %2106 = vmatpush1.bf16.msra.mxu1 %v5690_v37 }
 0x28f   :  { %2107 = vmatprep.subr.bf16.mxu1 %v5700_v30 }
 0x290   :  { %2000 = vmatpush1.bf16.msra.mxu0 %v5528_v55 }
 0x291   :  { %2001 = vmatprep.subr.bf16.mxu0 %v5541_v54 }
 0x292   :  { %2108 = vmatpush1.bf16.msra.mxu1 %v5712_v7 }
 0x293   :  { %4303 = vmatprep.subr.bf16.mxu1 %v5727_v24 }
 0x294   :  { %2002 = vmatpush1.bf16.msra.mxu0 %v5550_v40 }
 0x295   :  { %2040 = vmatprep.subr.bf16.mxu0 %v4887_v25 }
 0x348   :  { %v4285_v26 = vpop.f32.mrb[20].mxu1 }
 0x349   :  { %1782 = vadd.xlane.f32.xlu1 %v4285_v26  ;;  %v1761_v29 = vpop.f32.mrb[21].mxu1 }
 0x34a   :  { %1780 = vadd.xlane.f32.xlu0 %v1761_v29  ;;  %v4299_v37 = vpop.f32.mrb[20].mxu0 }
 0x34b   :  { %v1858_v38 = vpop.f32.mrb[21].mxu0 }
 0x34c   :  { %v4288_v39 = vpop.f32.mrb[22].mxu1 }
 0x34d   :  { %v1771_v43 = vpop.f32.mrb[23].mxu1 }
 0x34e   :  { %1877 = vadd.xlane.f32.xlu0 %v1858_v38  ;;  %1784 = vadd.xlane.f32.xlu1 %v1771_v43  ;;  %v4302_v44 = vpop.f32.mrb[22].mxu0  ;;  %v1918_v38 = vld [vmem:[%s6553_s7 + $0x8] sm:$0xff] }
 0x34f   :  { %v1868_v45 = vpop.f32.mrb[23].mxu0 }
 0x352   :  { %1879 = vadd.xlane.f32.xlu0 %v4299_v37  ;;  %1881 = vadd.xlane.f32.xlu1 %v1868_v45 }
 0x356   :  { %1786 = vadd.xlane.f32.xlu0 %v4288_v39 }
 0x35a   :  { %1883 = vadd.xlane.f32.xlu0 %v4302_v44 }
 0x3d6   :  { %v1783_v46 = vpop.xlane.xlu1 %1782 }
 0x3d7   :  { %v1781_v47 = vpop.xlane.xlu0 %1780  ;;  %v1886_v55 = vmul.f32 0.005, %v1783_v46  ;;  %v1904_v46 = vld [vmem:[%s6552_s6 + $0x18] sm:$0xff] }
 0x3d8   :  { %v1885_v48 = vmul.f32 0.005, %v1781_v47  ;;  %v1919_v47 = vld [vmem:[%s6553_s7 + $0x10] sm:$0xff] }
 0x3d9   :  { %v1894_v41 = vmul.f32 %v1886_v55, %v1886_v55 }
 0x3da   :  { %v1893_v56 = vmul.f32 %v1885_v48, %v1885_v48 }
 0x3db   :  { %v1878_v51 = vpop.xlane.xlu0 %1877  ;;  %v1785_v54 = vpop.xlane.xlu1 %1784 }
 0x3dc   :  { %v1889_v57 = vmul.f32 0.005, %v1878_v51  ;;  %v1887_v58 = vmul.f32 0.005, %v1785_v54 }
 0x3de   :  { %v1897_v59 = vsub.f32 %v1889_v57, %v1893_v56  ;;  %v1895_v63 = vmul.f32 %v1887_v58, %v1887_v58  ;;  %v1920_v56 = vld [vmem:[%s6553_s7 + $0x18] sm:$0xff]  ;;  %v2915_v57 = vld [vmem:[%s6555_s9] sm:$0xff] }
 0x3df   :  { %v1880_v62 = vpop.xlane.xlu0 %1879  ;;  %v1882_v60 = vpop.xlane.xlu1 %1881 }
 0x3e0   :  { %v1905_v40 = vadd.f32 1e-05, %v1897_v59  ;;  %v1890_v61 = vmul.f32 0.005, %v1880_v62  ;;  %v1891_v42 = vmul.f32 0.005, %v1882_v60 }
 0x3e1   :  { %v2916_v59 = vld [vmem:[%s6555_s9 + $0x8] sm:$0xff]  ;;  %v2918_v62 = vld [vmem:[%s6555_s9 + $0x18] sm:$0xff] }
 0x3e2   :  { %4869 = vrsqrt.f32 %v1905_v40  ;;  %v1898_v31 = vsub.f32 %v1890_v61, %v1894_v41  ;;  %v1899_v52 = vsub.f32 %v1891_v42, %v1895_v63  ;;  %v2917_v63 = vld [vmem:[%s6555_s9 + $0x10] sm:$0xff] }
 0x3e3   :  { %v1787_v49 = vpop.xlane.xlu0 %1786 }
 0x3e4   :  { %v1906_v27 = vadd.f32 1e-05, %v1898_v31  ;;  %v1907_v30 = vadd.f32 1e-05, %v1899_v52  ;;  %v1888_v7 = vmul.f32 0.005, %v1787_v49 }
 0x3e6   :  { %4871 = vrsqrt.f32 %v1906_v27  ;;  %v1896_v35 = vmul.f32 %v1888_v7, %v1888_v7 }
 0x3e7   :  { %4873 = vrsqrt.f32 %v1907_v30  ;;  %v1884_v6 = vpop.xlane.xlu0 %1883 }
 0x3e8   :  { %v1892_v17 = vmul.f32 0.005, %v1884_v6 }
 0x3ea   :  { %v1900_v8 = vsub.f32 %v1892_v17, %v1896_v35 }
 0x3ec   :  { %v4870_v18 = vpop.eup %4869  ;;  %v1908_v22 = vadd.f32 1e-05, %v1900_v8 }
 0x3ed   :  { %v1913_v20 = vmul.f32 %v4870_v18, %v1901_v12 }
 0x3ee   :  { %4875 = vrsqrt.f32 %v1908_v22 }
 0x3ef   :  { %1931 = vperm.xlu1 %4726, %v1913_v20   ;;  %v1921_v11 = vmul.f32 %v1913_v20, %v1885_v48 }
 0x3f0   :  { %v4872_v25 = vpop.eup %4871 }
 0x3f1   :  { %v4874_v26 = vpop.eup %4873  ;;  %v1914_v29 = vmul.f32 %v4872_v25, %v1902_v50  ;;  %v1925_v37 = vsub.f32 %v1917_v13, %v1921_v11  ;;  %v4889_v11 = vld [vmem:[%s6547_s1 + $0x54] ss:$36 sps:$4 sm:$0xff]  }
 0x3f2   :  { %v1915_v39 = vmul.f32 %v4874_v26, %v1903_v3  ;;  %v4891_v26 = vld [vmem:[%s6547_s1 + $0x9c] ss:$36 sps:$4 sm:$0xff]  }
 0x3f3   :  { %1936 = vperm.xlu0 %4725, %v1914_v29   ;;  %1955 = vperm.xlu1 %4726, %v1925_v37   ;;  %v1922_v43 = vmul.f32 %v1914_v29, %v1886_v55  ;;  %v4892_v29 = vld [vmem:[%s6547_s1 + $0x98] ss:$36 sps:$4 sm:$0xff]   ;;  %v4894_v37 = vld [vmem:[%s6547_s1 + $0xe0] ss:$36 sps:$4 sm:$0xff]  }
 0x3f4   :  { %v1923_v45 = vmul.f32 %v1915_v39, %v1887_v58 }
 0x3f5   :  { %v1926_v44 = vsub.f32 %v1918_v38, %v1922_v43  ;;  %v4896_v38 = vld [vmem:[%s6547_s1 + $0x128] ss:$36 sps:$4 sm:$0xff]   ;;  %v4899_v43 = vld [vmem:[%s6547_s1 + $0x1bc] ss:$36 sps:$4 sm:$0xff]  }
 0x3f6   :  { %v1927_v54 = vsub.f32 %v1919_v47, %v1923_v45  ;;  %v4903_v45 = vld [vmem:[%s6547_s1 + $0x1c] ss:$36 sps:$4 sm:$0xff]   ;;  %v4907_v47 = vld [vmem:[%s6547_s1 + $0xac] ss:$36 sps:$4 sm:$0xff]  }
 0x3f7   :  { %1960 = vperm.xlu1 %4726, %v1926_v44   ;;  %1941 = vperm.xlu0 %4725, %v1915_v39   ;;  %v4897_v39 = vld [vmem:[%s6547_s1 + $0x174] ss:$36 sps:$4 sm:$0xff]   ;;  %v4901_v44 = vld [vmem:[%s6547_s1 + $0x204] ss:$36 sps:$4 sm:$0xff]  }
 0x3f8   :  { %v4876_v48 = vpop.eup %4875 }
 0x3f9   :  { %v1916_v51 = vmul.f32 %v4876_v48, %v1904_v46  ;;  %v4906_v46 = vld [vmem:[%s6547_s1 + $0x60] ss:$36 sps:$4 sm:$0xff]   ;;  %v4908_v48 = vld [vmem:[%s6547_s1 + $0xa8] ss:$36 sps:$4 sm:$0xff]  }
 0x3fb   :  { %1946 = vperm.xlu1 %4726, %v1916_v51   ;;  %1965 = vperm.xlu0 %4725, %v1927_v54   ;;  %v1924_v55 = vmul.f32 %v1916_v51, %v1888_v7  ;;  %v4909_v51 = vld [vmem:[%s6547_s1 + $0xf4] ss:$36 sps:$4 sm:$0xff]  }
 0x3fc   :  { %v4910_v54 = vld [vmem:[%s6547_s1 + $0xf0] ss:$36 sps:$4 sm:$0xff]  }
 0x3fd   :  { %v1928_v58 = vsub.f32 %v1920_v56, %v1924_v55  ;;  %v4911_v56 = vld [vmem:[%s6547_s1 + $0x13c] ss:$36 sps:$4 sm:$0xff]  }
 0x3fe   :  { %v6654_v55 = vld [vmem:[#allocation89_spill] sm:$0xff] }
 0x3ff   :  { %1970 = vperm.xlu1 %4726, %v1928_v58   ;;  %2921 = vperm.xlu0 %4725, %v2915_v57   ;;  %v6655_v57 = vld [vmem:[#allocation90_spill] sm:$0xff]  ;;  %v6656_v58 = vld [vmem:[#allocation91_spill] sm:$0xff] }
 0x403   :  { %2926 = vperm.xlu1 %4726, %v2916_v59   ;;  %2931 = vperm.xlu0 %4725, %v2917_v63   ;;  %v6657_v59 = vld [vmem:[#allocation92_spill] sm:$0xff]  ;;  %v6658_v63 = vld [vmem:[#allocation93_spill] sm:$0xff] }
 0x407   :  { %2936 = vperm.xlu1 %4726, %v2918_v62  }
 0x46e   :  { %v1932_v60 = vpop.permute.xlu1 %1931 }
 0x46f   :  { %v1949_v41 = vmul.f32 %v1932_v60, %v5915_v2 }
 0x472   :  { %v1937_v40 = vpop.permute.xlu0 %1936  ;;  %v1956_v61 = vpop.permute.xlu1 %1955 }
 0x473   :  { %v1973_v42 = vadd.f32 %v1956_v61, %v1949_v41  ;;  %v1950_v31 = vmul.f32 %v1937_v40, %v5921_v10 }
 0x475   :  { %v1977_v27 = vmax.f32 %v1973_v42, 0.0 }
 0x476   :  { %v1942_v52 = vpop.permute.xlu0 %1941  ;;  %v1961_v49 = vpop.permute.xlu1 %1960 }
 0x477   :  { %v1974_v30 = vadd.f32 %v1961_v49, %v1950_v31  ;;  %v1951_v7 = vmul.f32 %v1942_v52, %v5919_v21  ;;  %v6040_v8 = vmul.f32 %v5909_v16, %v1977_v27  ;;  %v4888_v21 = vld [vmem:[%s6547_s1 + $0x8] ss:$36 sps:$4 sm:$0xff]  }
 0x479   :  { %v1978_v35 = vmax.f32 %v1974_v30, 0.0 }
 0x47a   :  { %v1966_v6 = vpop.permute.xlu0 %1965  ;;  %v1947_v17 = vpop.permute.xlu1 %1946 }
 0x47b   :  { %v6043_v12 = vmul.f32 %v5909_v16, %v1978_v35  ;;  %v1975_v2 = vadd.f32 %v1966_v6, %v1951_v7  ;;  %v1952_v10 = vmul.f32 %v1947_v17, %v5917_v9 }
 0x47d   :  { %v6047_v18 = vpack.c.bf16 %v6043_v12, %v6040_v8  ;;  %v1979_v20 = vmax.f32 %v1975_v2, 0.0 }
 0x47e   :  { %v1971_v22 = vpop.permute.xlu1 %1970 }
 0x47f   :  { %v1976_v50 = vadd.f32 %v1971_v22, %v1952_v10  ;;  %2020 = vmatmul.mubr.bf16.vlgmr.msra.gmra.mrb[24].mxu0 %v6047_v18  ;;  %2126 = vmatmul.mubr.bf16.vlgmr.msra.gmra.mrb[24].mxu1 %v6047_v18  ;;  %v6063_v9 = vmul.f32 %v5909_v16, %v1979_v20 }
 0x480   :  { %2041 = vmatpush1.bf16.msra.mxu0 %v4888_v21  ;;  %4304 = vmatpush3.bf16.msra.mxu1 %v5727_v24  ;;  %v4890_v24 = vld [vmem:[%s6547_s1 + $0x50] ss:$36 sps:$4 sm:$0xff]  }
 0x481   :  { %v1980_v13 = vmax.f32 %v1976_v50, 0.0  ;;  %2042 = vmatprep.subr.bf16.mxu0 %v4889_v11  ;;  %4305 = vmatprep.subr.bf16.mxu1 %v5748_v34  ;;  %v4853_v11 = vld [vmem:[%s6554_s8] sm:$0xff]  }
 0x482   :  { %2029 = vmatprep.mubr.bf16.mxu0 %v6648_v28  ;;  %2135 = vmatprep.mubr.bf16.mxu1 %v6648_v28 }
 0x483   :  { %v6066_v3 = vmul.f32 %v5909_v16, %v1980_v13  ;;  %v4852_v13 = vld [vmem:[%s6554_s8 + $0x18] sm:$0xff]  }
 0x484   :  { %2043 = vmatpush1.bf16.msra.mxu0 %v4890_v24  ;;  %4306 = vmatpush3.bf16.msra.mxu1 %v5748_v34  ;;  %v4893_v34 = vld [vmem:[%s6547_s1 + $0xe4] ss:$36 sps:$4 sm:$0xff]  }
 0x485   :  { %v6074_v25 = vpack.c.bf16 %v6066_v3, %v6063_v9  ;;  %2044 = vmatprep.subr.bf16.mxu0 %v4891_v26  ;;  %4307 = vmatprep.subr.bf16.mxu1 %v5763_v33  ;;  %v4854_v24 = vld [vmem:[%s6554_s8 + $0x8] sm:$0xff]  }
 0x487   :  { %2030 = vmatmul.mubr.bf16.gmra.mrb[28].mxu0 %v6074_v25  ;;  %2136 = vmatmul.mubr.bf16.gmra.mrb[28].mxu1 %v6074_v25 }
 0x488   :  { %2045 = vmatpush1.bf16.msra.mxu0 %v4892_v29  ;;  %4308 = vmatpush3.bf16.msra.mxu1 %v5763_v33  ;;  %v4895_v33 = vld [vmem:[%s6547_s1 + $0x12c] ss:$36 sps:$4 sm:$0xff]  }
 0x489   :  { %4319 = vmatprep.mubr.bf16.mxu1 %v6047_v18  ;;  %2046 = vmatprep.subr.bf16.mxu0 %v4893_v34 }
 0x48a   :  { %4309 = vmatprep.subr.bf16.mxu1 %v5772_v1  ;;  %2072 = vmatprep.mubr.bf16.mxu0 %v6648_v28 }
 0x48c   :  { %2047 = vmatpush1.bf16.msra.mxu0 %v4894_v37  ;;  %4310 = vmatpush3.bf16.msra.mxu1 %v5772_v1  ;;  %v4898_v1 = vld [vmem:[%s6547_s1 + $0x170] ss:$36 sps:$4 sm:$0xff]  }
 0x48d   :  { %2048 = vmatprep.subr.bf16.mxu0 %v4895_v33  ;;  %4311 = vmatprep.subr.bf16.mxu1 %v5785_v32 }
 0x490   :  { %2049 = vmatpush1.bf16.msra.mxu0 %v4896_v38  ;;  %4312 = vmatpush3.bf16.msra.mxu1 %v5785_v32  ;;  %v4900_v32 = vld [vmem:[%s6547_s1 + $0x1b8] ss:$36 sps:$4 sm:$0xff]  }
 0x491   :  { %2050 = vmatprep.subr.bf16.mxu0 %v4897_v39  ;;  %4313 = vmatprep.subr.bf16.mxu1 %v5792_v0 }
 0x494   :  { %2051 = vmatpush1.bf16.msra.mxu0 %v4898_v1  ;;  %4314 = vmatpush3.bf16.msra.mxu1 %v5792_v0  ;;  %v4902_v0 = vld [vmem:[%s6547_s1 + $0x200] ss:$36 sps:$4 sm:$0xff]  }
 0x495   :  { %2052 = vmatprep.subr.bf16.mxu0 %v4899_v43  ;;  %4315 = vmatprep.subr.bf16.mxu1 %v5800_v53 }
 0x498   :  { %2053 = vmatpush1.bf16.msra.mxu0 %v4900_v32  ;;  %4316 = vmatpush3.bf16.msra.mxu1 %v5800_v53  ;;  %v4904_v53 = vld [vmem:[%s6547_s1 + $0x18] ss:$36 sps:$4 sm:$0xff]  }
 0x499   :  { %2054 = vmatprep.subr.bf16.mxu0 %v4901_v44  ;;  %4317 = vmatprep.subr.bf16.mxu1 %v5807_v23 }
 0x49c   :  { %2055 = vmatpush1.bf16.msra.mxu0 %v4902_v0  ;;  %4318 = vmatpush3.bf16.msra.mxu1 %v5807_v23  ;;  %v4905_v23 = vld [vmem:[%s6547_s1 + $0x64] ss:$36 sps:$4 sm:$0xff]  }
 0x49d   :  { %2146 = vmatprep.subr.bf16.mxu0 %v4903_v45 }
 0x49f   :  { %2073 = vmatmul.mubr.bf16.vlgmr.msra.gmra.mrb[32].mxu0 %v6047_v18  ;;  %4320 = vmatmul.mubr.bf16.vlgmr.msra.gmra.mrb[32].mxu1 %v6074_v25 }
 0x4a0   :  { %2147 = vmatpush1.bf16.msra.mxu0 %v4904_v53  ;;  %2082 = vmatprep.mubr.bf16.mxu0 %v6648_v28 }
 0x4a1   :  { %2148 = vmatprep.subr.bf16.mxu0 %v4905_v23 }
 0x4a4   :  { %2149 = vmatpush1.bf16.msra.mxu0 %v4906_v46 }
 0x4a5   :  { %2150 = vmatprep.subr.bf16.mxu0 %v4907_v47 }
 0x4a7   :  { %2083 = vmatmul.mubr.bf16.gmra.mrb[36].mxu0 %v6074_v25 }
 0x4a8   :  { %2151 = vmatpush1.bf16.msra.mxu0 %v4908_v48  ;;  %2178 = vmatprep.mubr.bf16.mxu0 %v6648_v28 }
 0x4a9   :  { %2152 = vmatprep.subr.bf16.mxu0 %v4909_v51  ;;  %v4856_v51 = vld [vmem:[%s6554_s8 + $0x28] sm:$0xff]  }
 0x4ac   :  { %2153 = vmatpush1.bf16.msra.mxu0 %v4910_v54  ;;  %v4857_v54 = vld [vmem:[%s6554_s8 + $0x30] sm:$0xff]  }
 0x4ad   :  { %2154 = vmatprep.subr.bf16.mxu0 %v4911_v56  ;;  %v4858_v56 = vld [vmem:[%s6554_s8 + $0x38] sm:$0xff]  }
 0x4b0   :  { %2155 = vmatpush1.bf16.msra.mxu0 %v5695_v5  ;;  %v4851_v5 = vld [vmem:[%s6554_s8 + $0x10] sm:$0xff]  }
 0x4b1   :  { %2156 = vmatprep.subr.bf16.mxu0 %v5705_v36  ;;  %4327 = vmatprep.mubr.msk.bf16.mxu1 %vm1013_vm0, %v4851_v5 }
 0x4b4   :  { %2157 = vmatpush1.bf16.msra.mxu0 %v6654_v55  ;;  %v4859_v55 = vld [vmem:[%s6554_s8 + $0x40] sm:$0xff]  }
 0x4b5   :  { %2158 = vmatprep.subr.bf16.mxu0 %v6655_v57 }
 0x4b8   :  { %2159 = vmatpush1.bf16.msra.mxu0 %v6656_v58 }
 0x4b9   :  { %2160 = vmatprep.subr.bf16.mxu0 %v6657_v59 }
 0x4bc   :  { %2161 = vmatpush1.bf16.msra.mxu0 %v6658_v63 }
 0x4bf   :  { %2179 = vmatmul.mubr.bf16.vlgmr.msra.gmra.mrb[40].mxu0 %v6047_v18 }
 0x4c0   :  { %2188 = vmatprep.mubr.bf16.mxu0 %v6648_v28 }
 0x4c7   :  { %2189 = vmatmul.mubr.bf16.gmra.mrb[44].mxu0 %v6074_v25  ;;  %v4855_v25 = vld [vmem:[%s6554_s8 + $0x20] sm:$0xff]  }
 0x4c8   :  { %4403 = vmatprep.mubr.msk.f32.mxu0 %vm1013_vm0, %v5900_v14 }
 0x552   :  { %v2021_v36 = vpop.f32.mrb[24].mxu0  ;;  %v2127_v62 = vpop.f32.mrb[24].mxu1 }
 0x553   :  { %v2023_v60 = vpop.f32.mrb[25].mxu0  ;;  %v2129_v41 = vpop.f32.mrb[25].mxu1 }
 0x554   :  { %v2025_v40 = vpop.f32.mrb[26].mxu0  ;;  %v2131_v61 = vpop.f32.mrb[26].mxu1 }
 0x555   :  { %v2248_v42 = vpack.c.bf16 %v2025_v40, %v2021_v36  ;;  %v6176_v31 = vpack.c.bf16 %v2131_v61, %v2127_v62  ;;  %v2027_v28 = vpop.f32.mrb[27].mxu0  ;;  %v2133_v52 = vpop.f32.mrb[27].mxu1  ;;  %v4860_v62 = vld [vmem:[%s6554_s8 + $0x48] sm:$0xff]  }
 0x556   :  { %v2249_v49 = vpack.c.bf16 %v2027_v28, %v2023_v60  ;;  %v6178_v27 = vpack.c.bf16 %v2133_v52, %v2129_v41  ;;  %v4861_v60 = vld [vmem:[%s6554_s8 + $0x50] sm:$0xff]   ;;  %v4862_v52 = vld [vmem:[%s6554_s8 + $0x58] sm:$0xff]  }
 0x558   :  { %4323 = vmatprep.subr.bf16.mxu1 %v2249_v49 }
 0x559   :  { %4324 = vmatpush3.bf16.msra.mxu1 %v2249_v49  ;;  %v4863_v49 = vld [vmem:[%s6554_s8 + $0x60] sm:$0xff]  }
 0x55a   :  { %v2031_v30 = vpop.f32.mrb[28].mxu0  ;;  %v2137_v7 = vpop.f32.mrb[28].mxu1 }
 0x55b   :  { %v2033_v35 = vpop.f32.mrb[29].mxu0  ;;  %v2139_v6 = vpop.f32.mrb[29].mxu1 }
 0x55c   :  { %v2035_v17 = vpop.f32.mrb[30].mxu0  ;;  %v2141_v2 = vpop.f32.mrb[30].mxu1 }
 0x55d   :  { %v2257_v18 = vpack.c.bf16 %v2035_v17, %v2031_v30  ;;  %v2261_v10 = vpack.c.bf16 %v2141_v2, %v2137_v7  ;;  %v2037_v22 = vpop.f32.mrb[31].mxu0  ;;  %v2143_v20 = vpop.f32.mrb[31].mxu1  ;;  %v4865_v30 = vld [vmem:[%s6554_s8 + $0x70] sm:$0xff]   ;;  %v4866_v7 = vld [vmem:[%s6554_s8 + $0x78] sm:$0xff]  }
 0x55e   :  { %v2258_v50 = vpack.c.bf16 %v2037_v22, %v2033_v35  ;;  %v6180_v21 = vpack.c.bf16 %v2143_v20, %v2139_v6  ;;  %v4867_v35 = vld [vmem:[%s6554_s8 + $0x80] sm:$0xff]   ;;  %v4868_v6 = vld [vmem:[%s6554_s8 + $0x88] sm:$0xff]   ;;  %v2927_v17 = vpop.permute.xlu1 %2926  ;;  %v2922_v2 = vpop.permute.xlu0 %2921 }
 0x560   :  { %4325 = vmatprep.subr.bf16.mxu1 %v2258_v50 }
 0x561   :  { %4326 = vmatpush3.bf16.msra.mxu1 %v2258_v50  ;;  %v2939_v50 = vmul.f32 %v5909_v16, %v2922_v2 }
 0x562   :  { %4331 = vmatprep.subr.bf16.mxu1 %v2248_v42  ;;  %v2932_v22 = vpop.permute.xlu0 %2931 }
 0x564   :  { %4328 = vmatmul.mubr.msk.bf16.vlgmr.msra.gmra.mrb[36].mxu1 %vm1013_vm0, %v4852_v13 }
 0x565   :  { %4332 = vmatpush3.bf16.msra.mxu1 %v2248_v42  ;;  %4335 = vmatprep.mubr.msk.bf16.mxu1 %vm1013_vm0, %v4853_v11 }
 0x566   :  { %4333 = vmatprep.subr.bf16.mxu1 %v2257_v18 }
 0x569   :  { %4334 = vmatpush3.bf16.msra.mxu1 %v2257_v18  ;;  %v2937_v18 = vpop.permute.xlu1 %2936 }
 0x56a   :  { %v2942_v13 = vmul.f32 %v5909_v16, %v2937_v18 }
 0x570   :  { %4336 = vmatmul.mubr.msk.bf16.vlgmr.msra.gmra.mrb[36].mxu1 %vm1013_vm0, %v4854_v24 }
 0x571   :  { %4343 = vmatprep.mubr.msk.bf16.mxu1 %vm1013_vm0, %v4855_v25  ;;  %v2941_v25 = vmul.f32 %v5909_v16, %v2932_v22 }
 0x572   :  { %v2074_v26 = vpop.f32.mrb[32].mxu0  ;;  %v4321_v29 = vpop.f32.mrb[32].mxu1 }
 0x573   :  { %v2076_v34 = vpop.f32.mrb[33].mxu0  ;;  %v2233_v37 = vpop.f32.mrb[33].mxu1 }
 0x574   :  { %v2078_v33 = vpop.f32.mrb[34].mxu0  ;;  %v4322_v38 = vpop.f32.mrb[34].mxu1 }
 0x575   :  { %v2250_v39 = vpack.c.bf16 %v2078_v33, %v2074_v26  ;;  %v6198_v1 = vpack.c.bf16 %v4322_v38, %v4321_v29  ;;  %v2080_v43 = vpop.f32.mrb[35].mxu0  ;;  %v2236_v32 = vpop.f32.mrb[35].mxu1 }
 0x576   :  { %v2251_v44 = vpack.c.bf16 %v2080_v43, %v2076_v34  ;;  %v6200_v0 = vpack.c.bf16 %v2236_v32, %v2233_v37 }
 0x577   :  { %4339 = vmatprep.subr.bf16.mxu1 %v2250_v39 }
 0x578   :  { %4340 = vmatpush3.bf16.msra.mxu1 %v2250_v39 }
 0x57a   :  { %v2084_v45 = vpop.f32.mrb[36].mxu0 }
 0x57b   :  { %v2086_v53 = vpop.f32.mrb[37].mxu0 }
 0x57c   :  { %v2088_v23 = vpop.f32.mrb[38].mxu0 }
 0x57d   :  { %v2259_v46 = vpack.c.bf16 %v2088_v23, %v2084_v45  ;;  %v2090_v47 = vpop.f32.mrb[39].mxu0 }
 0x57e   :  { %v2260_v48 = vpack.c.bf16 %v2090_v47, %v2086_v53 }
 0x57f   :  { %4341 = vmatprep.subr.bf16.mxu1 %v2259_v46 }
 0x580   :  { %4342 = vmatpush3.bf16.msra.mxu1 %v2259_v46 }
 0x581   :  { %4347 = vmatprep.subr.bf16.mxu1 %v2251_v44 }
 0x583   :  { %4344 = vmatmul.mubr.msk.bf16.vlgmr.msra.gmra.mrb[36].mxu1 %vm1013_vm0, %v4856_v51 }
 0x584   :  { %4348 = vmatpush3.bf16.msra.mxu1 %v2251_v44  ;;  %4351 = vmatprep.mubr.msk.bf16.mxu1 %vm1013_vm0, %v4857_v54 }
 0x585   :  { %4349 = vmatprep.subr.bf16.mxu1 %v2260_v48 }
 0x588   :  { %4350 = vmatpush3.bf16.msra.mxu1 %v2260_v48 }
 0x589   :  { %4355 = vmatprep.subr.bf16.mxu1 %v6176_v31 }
 0x58f   :  { %4352 = vmatmul.mubr.msk.bf16.vlgmr.msra.gmra.mrb[36].mxu1 %vm1013_vm0, %v4858_v56 }
 0x590   :  { %4356 = vmatpush3.bf16.msra.mxu1 %v6176_v31  ;;  %4359 = vmatprep.mubr.msk.bf16.mxu1 %vm1013_vm0, %v4859_v55 }
 0x591   :  { %4357 = vmatprep.subr.bf16.mxu1 %v2261_v10 }
 0x592   :  { %v2180_v57 = vpop.f32.mrb[40].mxu0 }
 0x593   :  { %v2182_v58 = vpop.f32.mrb[41].mxu0 }
 0x594   :  { %4358 = vmatpush3.bf16.msra.mxu1 %v2261_v10  ;;  %v2184_v59 = vpop.f32.mrb[42].mxu0 }
 0x595   :  { %v2254_v63 = vpack.c.bf16 %v2184_v59, %v2180_v57  ;;  %4363 = vmatprep.subr.bf16.mxu1 %v6178_v27  ;;  %v2186_v5 = vpop.f32.mrb[43].mxu0 }
 0x596   :  { %v2255_v36 = vpack.c.bf16 %v2186_v5, %v2182_v58 }
 0x59a   :  { %v2190_v41 = vpop.f32.mrb[44].mxu0 }
 0x59b   :  { %v2192_v40 = vpop.f32.mrb[45].mxu0  ;;  %4360 = vmatmul.mubr.msk.bf16.vlgmr.msra.gmra.mrb[36].mxu1 %vm1013_vm0, %v4860_v62 }
 0x59c   :  { %4364 = vmatpush3.bf16.msra.mxu1 %v6178_v27  ;;  %v2194_v61 = vpop.f32.mrb[46].mxu0  ;;  %4367 = vmatprep.mubr.msk.bf16.mxu1 %vm1013_vm0, %v4861_v60  ;;  %v4864_v27 = vld [vmem:[%s6554_s8 + $0x68] sm:$0xff]  }
 0x59d   :  { %v2263_v42 = vpack.c.bf16 %v2194_v61, %v2190_v41  ;;  %4365 = vmatprep.subr.bf16.mxu1 %v6180_v21  ;;  %v2196_v31 = vpop.f32.mrb[47].mxu0 }
 0x59e   :  { %v2264_v28 = vpack.c.bf16 %v2196_v31, %v2192_v40 }
 0x5a0   :  { %4366 = vmatpush3.bf16.msra.mxu1 %v6180_v21  ;;  %v2940_v21 = vmul.f32 %v5909_v16, %v2927_v17  ;;  %v3154_v17 = vld [vmem:[%s6556_s10 + $0x8] sm:$0xff] }
 0x5a1   :  { %4371 = vmatprep.subr.bf16.mxu1 %v2254_v63 }
 0x5a7   :  { %4368 = vmatmul.mubr.msk.bf16.vlgmr.msra.gmra.mrb[36].mxu1 %vm1013_vm0, %v4862_v52 }
 0x5a8   :  { %4372 = vmatpush3.bf16.msra.mxu1 %v2254_v63  ;;  %4375 = vmatprep.mubr.msk.bf16.mxu1 %vm1013_vm0, %v4863_v49 }
 0x5a9   :  { %4373 = vmatprep.subr.bf16.mxu1 %v2263_v42 }
 0x5ac   :  { %4374 = vmatpush3.bf16.msra.mxu1 %v2263_v42 }
 0x5ad   :  { %4379 = vmatprep.subr.bf16.mxu1 %v2255_v36 }
 0x5b3   :  { %4376 = vmatmul.mubr.msk.bf16.vlgmr.msra.gmra.mrb[36].mxu1 %vm1013_vm0, %v4864_v27 }
 0x5b4   :  { %4380 = vmatpush3.bf16.msra.mxu1 %v2255_v36  ;;  %4383 = vmatprep.mubr.msk.bf16.mxu1 %vm1013_vm0, %v4865_v30 }
 0x5b5   :  { %4381 = vmatprep.subr.bf16.mxu1 %v2264_v28 }
 0x5b8   :  { %4382 = vmatpush3.bf16.msra.mxu1 %v2264_v28 }
 0x5b9   :  { %4387 = vmatprep.subr.bf16.mxu1 %v6200_v0 }
 0x5bf   :  { %4384 = vmatmul.mubr.msk.bf16.vlgmr.msra.gmra.mrb[36].mxu1 %vm1013_vm0, %v4866_v7 }
 0x5c0   :  { %4388 = vmatpush3.bf16.msra.mxu1 %v6200_v0  ;;  %4391 = vmatprep.mubr.msk.bf16.mxu1 %vm1013_vm0, %v4867_v35 }
 0x5c1   :  { %4389 = vmatprep.subr.bf16.mxu1 %v6198_v1 }
 0x5c4   :  { %4390 = vmatpush3.bf16.msra.mxu1 %v6198_v1 }
 0x5cb   :  { %4392 = vmatmul.mubr.msk.bf16.vlgmr.msra.gmra.mrb[36].mxu1 %vm1013_vm0, %v4868_v6 }
 0x69e   :  { %v4393_v10 = vpop.f32.mrb[36].mxu1 }
 0x69f   :  { %v2896_v20 = vpop.f32.mrb[37].mxu1  ;;  %v6274_v37 = vadd.f32 %v4393_v10, %v2941_v25  ;;  %v3170_v10 = vld [vmem:[%s6557_s11 + $0x8] sm:$0xff]  ;;  %v3156_v25 = vld [vmem:[%s6556_s10 + $0x18] sm:$0xff] }
 0x6a0   :  { %v4394_v11 = vpop.f32.mrb[38].mxu1  ;;  %v6268_v26 = vadd.f32 %v2939_v50, %v2896_v20  ;;  %v3153_v20 = vld [vmem:[%s6556_s10] sm:$0xff]  ;;  %v3155_v50 = vld [vmem:[%s6556_s10 + $0x10] sm:$0xff] }
 0x6a1   :  { %v2899_v24 = vpop.f32.mrb[39].mxu1  ;;  %v6270_v29 = vadd.f32 %v4394_v11, %v2942_v13  ;;  %v3042_v32 = vmul.f32 %v6274_v37, %v6274_v37 }
 0x6a2   :  { %v6272_v34 = vadd.f32 %v2940_v21, %v2899_v24  ;;  %v3040_v16 = vmul.f32 %v6268_v26, %v6268_v26 }
 0x6a3   :  { %v4643_v39 = vpack.c.bf16 %v6270_v29, %v6274_v37  ;;  %v3043_v1 = vmul.f32 %v6270_v29, %v6270_v29 }
 0x6a4   :  { %v4639_v33 = vpack.c.bf16 %v6272_v34, %v6268_v26  ;;  %v3041_v38 = vmul.f32 %v6272_v34, %v6272_v34 }
 0x6a5   :  { %v4651_v44 = vpack.c.bf16 %v3043_v1, %v3042_v32 }
 0x6a6   :  { %4640 = vmatprep.subr.bf16.mxu0 %v4639_v33  ;;  %v4647_v43 = vpack.c.bf16 %v3041_v38, %v3040_v16  ;;  %v3171_v38 = vld [vmem:[%s6557_s11 + $0x10] sm:$0xff] }
 0x6a7   :  { %4642 = vmatpush3.bf16.msra.mxu0 %v4639_v33 }
 0x6a8   :  { %4644 = vmatprep.subr.bf16.mxu0 %v4643_v39 }
 0x6ab   :  { %4646 = vmatpush3.bf16.msra.mxu0 %v4643_v39 }
 0x6ac   :  { %4648 = vmatprep.subr.bf16.mxu0 %v4647_v43 }
 0x6ae   :  { %4404 = vmatmul.mubr.msk.f32.vlgmr.msra.gmra.mrb[48].mxu0 %vm1013_vm0, %v5938_v19 }
 0x6af   :  { %4650 = vmatpush3.bf16.msra.mxu0 %v4647_v43  ;;  %4406 = vmatprep.mubr.msk.f32.mxu0 %vm1013_vm0, %v5943_v15 }
 0x6b0   :  { %4652 = vmatprep.subr.bf16.mxu0 %v4651_v44 }
 0x6b2   :  { %4407 = vmatmul.mubr.msk.f32.gmra.mrb[50].mxu0 %vm1013_vm0, %v5954_v4 }
 0x6b3   :  { %4654 = vmatpush3.bf16.msra.mxu0 %v4651_v44  ;;  %4417 = vmatprep.mubr.msk.f32.mxu0 %vm1013_vm0, %v5900_v14  ;;  %v3169_v44 = vld [vmem:[%s6557_s11] sm:$0xff] }
 0x6b6   :  { %4418 = vmatmul.mubr.msk.f32.vlgmr.msra.gmra.mrb[52].mxu0 %vm1013_vm0, %v5938_v19 }
 0x6b7   :  { %4420 = vmatprep.mubr.msk.f32.mxu0 %vm1013_vm0, %v5943_v15 }
 0x6ba   :  { %4421 = vmatmul.mubr.msk.f32.gmra.mrb[54].mxu0 %vm1013_vm0, %v5954_v4 }
 0x781   :  { %v4405_v0 = vpop.f32.mrb[48].mxu0 }
 0x782   :  { %v3013_v45 = vpop.f32.mrb[49].mxu0  ;;  %3034 = vadd.xlane.f32.xlu1 %v4405_v0 }
 0x783   :  { %3032 = vadd.xlane.f32.xlu0 %v3013_v45 }
 0x785   :  { %v4408_v53 = vpop.f32.mrb[50].mxu0 }
 0x786   :  { %v3023_v23 = vpop.f32.mrb[51].mxu0 }
 0x787   :  { %3038 = vadd.xlane.f32.xlu0 %v4408_v53  ;;  %v3172_v53 = vld [vmem:[%s6557_s11 + $0x18] sm:$0xff] }
 0x789   :  { %v4419_v46 = vpop.f32.mrb[52].mxu0 }
 0x78a   :  { %3131 = vadd.xlane.f32.xlu1 %v4419_v46  ;;  %v3110_v47 = vpop.f32.mrb[53].mxu0 }
 0x78b   :  { %3036 = vadd.xlane.f32.xlu0 %v3023_v23 }
 0x78d   :  { %v4422_v14 = vpop.f32.mrb[54].mxu0 }
 0x78e   :  { %v3120_v48 = vpop.f32.mrb[55].mxu0 }
 0x78f   :  { %3129 = vadd.xlane.f32.xlu0 %v3110_v47  ;;  %3133 = vadd.xlane.f32.xlu1 %v3120_v48 }
 0x793   :  { %3135 = vadd.xlane.f32.xlu0 %v4422_v14 }
 0x80f   :  { %v3035_v15 = vpop.xlane.xlu1 %3034 }
 0x810   :  { %v3033_v19 = vpop.xlane.xlu0 %3032  ;;  %v3138_v51 = vmul.f32 0.005, %v3035_v15 }
 0x811   :  { %v3137_v56 = vmul.f32 0.005, %v3033_v19 }
 0x812   :  { %v3146_v55 = vmul.f32 %v3138_v51, %v3138_v51 }
 0x813   :  { %v3145_v5 = vmul.f32 %v3137_v56, %v3137_v56 }
 0x814   :  { %v3039_v4 = vpop.xlane.xlu0 %3038 }
 0x815   :  { %v3140_v41 = vmul.f32 0.005, %v3039_v4 }
 0x817   :  { %v3132_v54 = vpop.xlane.xlu1 %3131  ;;  %v3148_v49 = vmul.f32 %v3140_v41, %v3140_v41 }
 0x818   :  { %v3142_v57 = vmul.f32 0.005, %v3132_v54  ;;  %v3037_v58 = vpop.xlane.xlu0 %3036 }
 0x819   :  { %v3139_v59 = vmul.f32 0.005, %v3037_v58 }
 0x81a   :  { %v3150_v63 = vsub.f32 %v3142_v57, %v3146_v55 }
 0x81b   :  { %v3147_v40 = vmul.f32 %v3139_v59, %v3139_v59 }
 0x81c   :  { %v3158_v36 = vadd.f32 1e-05, %v3150_v63  ;;  %v3130_v62 = vpop.xlane.xlu0 %3129  ;;  %v3134_v60 = vpop.xlane.xlu1 %3133 }
 0x81d   :  { %v3141_v61 = vmul.f32 0.005, %v3130_v62  ;;  %v3143_v42 = vmul.f32 0.005, %v3134_v60 }
 0x81e   :  { %4877 = vrsqrt.f32 %v3158_v36 }
 0x81f   :  { %v3149_v31 = vsub.f32 %v3141_v61, %v3145_v5  ;;  %v3151_v28 = vsub.f32 %v3143_v42, %v3147_v40 }
 0x820   :  { %v3136_v52 = vpop.xlane.xlu0 %3135 }
 0x821   :  { %v3157_v27 = vadd.f32 1e-05, %v3149_v31  ;;  %v3159_v30 = vadd.f32 1e-05, %v3151_v28  ;;  %v3144_v7 = vmul.f32 0.005, %v3136_v52 }
 0x823   :  { %4879 = vrsqrt.f32 %v3157_v27  ;;  %v3152_v35 = vsub.f32 %v3144_v7, %v3148_v49 }
 0x824   :  { %4881 = vrsqrt.f32 %v3159_v30 }
 0x825   :  { %v3160_v6 = vadd.f32 1e-05, %v3152_v35 }
 0x827   :  { %4883 = vrsqrt.f32 %v3160_v6 }
 0x828   :  { %v4878_v2 = vpop.eup %4877 }
 0x829   :  { %v3166_v18 = vmul.f32 %v4878_v2, %v3154_v17 }
 0x82b   :  { %3188 = vperm.xlu0 %4725, %v3166_v18   ;;  %v3174_v22 = vmul.f32 %v3166_v18, %v3138_v51 }
 0x82d   :  { %v4880_v21 = vpop.eup %4879  ;;  %v3178_v13 = vsub.f32 %v3170_v10, %v3174_v22 }
 0x82e   :  { %v4882_v11 = vpop.eup %4881  ;;  %v3165_v24 = vmul.f32 %v4880_v21, %v3153_v20 }
 0x82f   :  { %3212 = vperm.xlu0 %4725, %v3178_v13   ;;  %v3167_v33 = vmul.f32 %v4882_v11, %v3155_v50 }
 0x830   :  { %3183 = vperm.xlu1 %4726, %v3165_v24   ;;  %v3173_v32 = vmul.f32 %v3165_v24, %v3137_v56 }
 0x831   :  { %v4884_v39 = vpop.eup %4883  ;;  %v3175_v16 = vmul.f32 %v3167_v33, %v3139_v59 }
 0x832   :  { %v3168_v1 = vmul.f32 %v4884_v39, %v3156_v25  ;;  %v3177_v0 = vsub.f32 %v3169_v44, %v3173_v32 }
 0x833   :  { %v3179_v43 = vsub.f32 %v3171_v38, %v3175_v16 }
 0x834   :  { %3198 = vperm.xlu1 %4726, %v3168_v1   ;;  %v3176_v45 = vmul.f32 %v3168_v1, %v3140_v41 }
 0x835   :  { %3217 = vperm.xlu0 %4725, %v3179_v43  }
 0x836   :  { %v3180_v23 = vsub.f32 %v3172_v53, %v3176_v45 }
 0x838   :  { %3193 = vperm.xlu1 %4726, %v3167_v33  }
 0x83c   :  { %3207 = vperm.xlu1 %4726, %v3177_v0  }
 0x840   :  { %3222 = vperm.xlu1 %4726, %v3180_v23  }
 0x8aa   :  { %v3189_v46 = vpop.permute.xlu0 %3188 }
 0x8ab   :  { %v3202_v19 = vmul.f32 %v3189_v46, %v6272_v34  ;;  %v4912_v34 = vld [vmem:[%s6549_s3] ss:$0 sm:$0xff] }
 0x8ae   :  { %v3213_v14 = vpop.permute.xlu0 %3212 }
 0x8af   :  { %v3184_v47 = vpop.permute.xlu1 %3183  ;;  %v3226_v51 = vadd.f32 %v3213_v14, %v3202_v19 }
 0x8b0   :  { %v3201_v56 = vmul.f32 %v3184_v47, %v6268_v26 }
 0x8b1   :  { %v3230_v58 = vmax.f32 %v3226_v51, 0.0 }
 0x8b3   :  { %v3199_v48 = vpop.permute.xlu1 %3198  ;;  %v3234_v60 = vmul.f32 %v4912_v34, %v3230_v58 }
 0x8b4   :  { %v3218_v54 = vpop.permute.xlu0 %3217  ;;  %v3204_v63 = vmul.f32 %v3199_v48, %v6270_v29 }
 0x8b7   :  { %v3194_v15 = vpop.permute.xlu1 %3193 }
 0x8b8   :  { %v3203_v4 = vmul.f32 %v3194_v15, %v6274_v37 }
 0x8ba   :  { %v3227_v55 = vadd.f32 %v3218_v54, %v3203_v4 }
 0x8bb   :  { %v3208_v57 = vpop.permute.xlu1 %3207 }
 0x8bc   :  { %v3225_v59 = vadd.f32 %v3208_v57, %v3201_v56  ;;  %v3231_v5 = vmax.f32 %v3227_v55, 0.0 }
 0x8be   :  { %v3229_v36 = vmax.f32 %v3225_v59, 0.0  ;;  %v3235_v37 = vmul.f32 %v4912_v34, %v3231_v5 }
 0x8bf   :  { %v3223_v62 = vpop.permute.xlu1 %3222 }
 0x8c0   :  { %v3233_v41 = vmul.f32 %v4912_v34, %v3229_v36  ;;  %v3228_v40 = vadd.f32 %v3223_v62, %v3204_v63 }
 0x8c2   :  { %v3237_v61 = vadd.f32 %v3234_v60, %v3233_v41  ;;  %v3232_v42 = vmax.f32 %v3228_v40, 0.0 }
 0x8c4   :  { %v3236_v26 = vmul.f32 %v4912_v34, %v3232_v42  ;;  %v3238_v31 = vadd.f32 %v3237_v61, %v3235_v37 }
 0x8c6   :  { %v3239_v28 = vadd.f32 %v3238_v31, %v3236_v26 }
 0x8c8   :  { %3240 = vadd.xlane.f32.xlu0 %v3239_v28 }
 0x955   :  { %v3241_v52 = vpop.xlane.xlu0 %3240 }
 0x956   :  { %v3242_v49 = vrot.slane %v3241_v52, 4 }
 0x958   :  { %v3243_v29 = vadd.f32 %v3242_v49, %v3241_v52 }
 0x95a   :  { %v3244_v27 = vrot.slane %v3243_v29, 2 }
 0x95c   :  { %v3245_v30 = vadd.f32 %v3244_v27, %v3243_v29 }
 0x95e   :  { %v3246_v7 = vrot.slane %v3245_v30, 1 }
 0x960   :  { %v3247_v35 = vadd.f32 %v3246_v7, %v3245_v30 }
 0x962   :  { %4719 = vpush %v3247_v35 }
 0x993   :  { %s4720_s9 = spop %4719 }
 0x994   :  { %v3249_v6 = vstv %s4720_s9 }
 0x995   :  { %4885 = vrcp.f32 %v3249_v6 }
 0x99f   :  { %v4886_v17 = vpop.eup %4885 }
 0x9a0   :  { %v3251_v2 = vmul.f32 %v4886_v17, %v6040_v8  ;;  %v3252_v18 = vmul.f32 %v4886_v17, %v6043_v12  ;;  %v3253_v10 = vmul.f32 %v4886_v17, %v6063_v9  ;;  %v3254_v22 = vmul.f32 %v4886_v17, %v6066_v3 }
 0x9a2   :  { %v6337_v20 = vpack.c.bf16 %v3252_v18, %v3251_v2  ;;  %v6339_v50 = vpack.c.bf16 %v3254_v22, %v3253_v10 }
 0x9a3   :  { %4935 = dma.done.wait [#allocation3], 10240 }
 0x9a4   :  { %4936 = vsyncadd [#allocation3], 4294957056  ;;  %v4940_v21 = vmov 0.0   ;;  %vm4941_vm1 = vmmov 0   ;;  %v6659_v8 = vld [vmem:[#allocation17_spill] sm:$0xff]  ;;  %v6661_v9 = vld [vmem:[#allocation18_spill] sm:$0xff] }
 0x9a5   :  { %4423 = vmatprep.subr.bf16.mxu0 %v4940_v21  ;;  %4439 = vmatprep.mubr.msk.bf16.mxu0 %vm4941_vm1, %v4940_v21  ;;  %v6660_v12 = vld [vmem:[#allocation25_spill] sm:$0xff]  ;;  %v6662_v3 = vld [vmem:[#allocation26_spill] sm:$0xff]  ;;  %v6663_v13 = vld [vmem:[#allocation19_spill] sm:$0xff]  ;;  %v3278_v32 = vrot.slane %v6337_v20, 1  ;;  %v3368_v45 = vrot.slane %v6337_v20, 2  ;;  %v3470_v59 = vrot.slane %v6337_v20, 4 }
 0x9a6   :  { %4424 = vmatpush3.bf16.msra.mxu0 %v6659_v8  ;;  %4463 = vmatprep.subr.bf16.mxu1 %v4940_v21  ;;  %v6664_v11 = vld [vmem:[#allocation27_spill] sm:$0xff]  ;;  %v6665_v24 = vld [vmem:[#allocation20_spill] sm:$0xff]  ;;  %v6667_v33 = vld [vmem:[#allocation21_spill] sm:$0xff]  ;;  %v3419_v49 = vrot.slane %v6337_v20, 3  ;;  %v3572_v27 = vrot.slane %v6337_v20, 6  ;;  %s4942_s19 = smov [#allocation4]  }
 0x9a7   :  { %4425 = vmatprep.subr.bf16.mxu0 %v4940_v21  ;;  %4464 = vmatpush3.bf16.msra.mxu1 %v6660_v12  ;;  %v6666_v25 = vld [vmem:[#allocation28_spill] sm:$0xff]  ;;  %v6668_v38 = vld [vmem:[#allocation29_spill] sm:$0xff]  ;;  %v6669_v39 = vld [vmem:[#allocation22_spill] sm:$0xff]  ;;  %s3782_s20 = sshll.u32 %s4942_s19, 4  ;;  %s3783_s20 = int_to_ptr.vmem [resolvable:$true] %s3782_s20 }
 0x9a8   :  { %4465 = vmatprep.subr.bf16.mxu1 %v4940_v21  ;;  %4479 = vmatprep.mubr.msk.bf16.mxu1 %vm4941_vm1, %v4940_v21  ;;  %v6670_v16 = vld [vmem:[#allocation30_spill] sm:$0xff]  ;;  %v6671_v1 = vld [vmem:[#allocation23_spill] sm:$0xff]  ;;  %v6673_v44 = vld [vmem:[#allocation24_spill] sm:$0xff]  ;;  %s4913_s21 = scalar_lea.vmem %s3783_s20, 32  ;;  %p4918_p1 = scmp.lt.s32.totalorder %s3783_s20, %s3783_s20 }
 0x9a9   :  { %v6672_v43 = vld [vmem:[#allocation31_spill] sm:$0xff]  ;;  %v6674_v0 = vld [vmem:[#allocation32_spill] sm:$0xff]  ;;  %v6675_v53 = vld [vmem:[#allocation9_spill] sm:$0xff]  ;;  %p4914_p0 = scmp.ne.s32.totalorder %s3783_s20, %s4913_s21  ;;  %p4919_p2 = scmp.lt.s32.totalorder %s4913_s21, %s4913_s21 }
 0x9aa   :  { %4426 = vmatpush3.bf16.msra.mxu0 %v6661_v9  ;;  %v6676_v23 = vld [vmem:[#allocation41_spill] sm:$0xff]  ;;  %v6677_v46 = vld [vmem:[#allocation10_spill] sm:$0xff]  ;;  %v6679_v14 = vld [vmem:[#allocation11_spill] sm:$0xff] }
 0x9ab   :  { %4427 = vmatprep.subr.bf16.mxu0 %v4940_v21  ;;  %4466 = vmatpush3.bf16.msra.mxu1 %v6662_v3  ;;  %v6678_v47 = vld [vmem:[#allocation42_spill] sm:$0xff]  ;;  %v6680_v48 = vld [vmem:[#allocation43_spill] sm:$0xff]  ;;  %v6681_v19 = vld [vmem:[#allocation12_spill] sm:$0xff]  ;;  %p4920_p3 = por %p4919_p2, %p4918_p1 }
 0x9ac   :  { %4467 = vmatprep.subr.bf16.mxu1 %v4940_v21  ;;  %v6682_v15 = vld [vmem:[#allocation44_spill] sm:$0xff]  ;;  %v6683_v51 = vld [vmem:[#allocation13_spill] sm:$0xff]  ;;  %v6685_v54 = vld [vmem:[#allocation14_spill] sm:$0xff] }
 0x9ad   :  { %v6684_v4 = vld [vmem:[#allocation45_spill] sm:$0xff]  ;;  %v6686_v56 = vld [vmem:[#allocation46_spill] sm:$0xff]  ;;  %v6687_v55 = vld [vmem:[#allocation15_spill] sm:$0xff]  ;;  %p4921_p4 = pnand %p4920_p3, %p4914_p0 }
 0x9ae   :  { %4428 = vmatpush3.bf16.msra.mxu0 %v6663_v13  ;;  %v6688_v57 = vld [vmem:[#allocation47_spill] sm:$0xff]  ;;  %v6689_v58 = vld [vmem:[#allocation16_spill] sm:$0xff]  ;;  %v6691_v5 = vld [vmem:[#allocation33_spill] sm:$0xff] }
 0x9af   :  { %4429 = vmatprep.subr.bf16.mxu0 %v4940_v21  ;;  %4468 = vmatpush3.bf16.msra.mxu1 %v6664_v11  ;;  %v6690_v63 = vld [vmem:[#allocation48_spill] sm:$0xff]  ;;  %v6692_v36 = vld [vmem:[#allocation57_spill] sm:$0xff]  ;;  %v6693_v62 = vld [vmem:[#allocation34_spill] sm:$0xff] }
 0x9b0   :  { %4469 = vmatprep.subr.bf16.mxu1 %v4940_v21  ;;  %v6694_v34 = vld [vmem:[#allocation58_spill] sm:$0xff]  ;;  %v6695_v60 = vld [vmem:[#allocation35_spill] sm:$0xff]  ;;  %v6697_v40 = vld [vmem:[#allocation36_spill] sm:$0xff] }
 0x9b1   :  { %v6696_v41 = vld [vmem:[#allocation59_spill] sm:$0xff]  ;;  %v6698_v37 = vld [vmem:[#allocation60_spill] sm:$0xff]  ;;  %v6699_v61 = vld [vmem:[#allocation37_spill] sm:$0xff] }
 0x9b2   :  { %4430 = vmatpush3.bf16.msra.mxu0 %v6665_v24  ;;  %v6700_v42 = vld [vmem:[#allocation61_spill] sm:$0xff]  ;;  %v6701_v26 = vld [vmem:[#allocation38_spill] sm:$0xff]  ;;  %v6703_v28 = vld [vmem:[#allocation39_spill] sm:$0xff]  ;;  %v3521_v24 = vrot.slane %v6337_v20, 5 }
 0x9b3   :  { %4431 = vmatprep.subr.bf16.mxu0 %v4940_v21  ;;  %4470 = vmatpush3.bf16.msra.mxu1 %v6666_v25  ;;  %v6702_v31 = vld [vmem:[#allocation62_spill] sm:$0xff]  ;;  %v6704_v52 = vld [vmem:[#allocation63_spill] sm:$0xff]  ;;  %v6705_v29 = vld [vmem:[#allocation40_spill] sm:$0xff] }
 0x9b4   :  { %4471 = vmatprep.subr.bf16.mxu1 %v4940_v21  ;;  %v6706_v30 = vld [vmem:[#allocation64_spill] sm:$0xff]  ;;  %v6707_v7 = vld [vmem:[#allocation49_spill] sm:$0xff]  ;;  %v6709_v6 = vld [vmem:[#allocation50_spill] sm:$0xff] }
 0x9b5   :  { %v6708_v35 = vld [vmem:[#allocation73_spill] sm:$0xff]  ;;  %v6710_v17 = vld [vmem:[#allocation74_spill] sm:$0xff]  ;;  %v6711_v2 = vld [vmem:[#allocation51_spill] sm:$0xff] }
 0x9b6   :  { %4432 = vmatpush3.bf16.msra.mxu0 %v6667_v33  ;;  %v6712_v18 = vld [vmem:[#allocation75_spill] sm:$0xff]  ;;  %v6713_v10 = vld [vmem:[#allocation52_spill] sm:$0xff]  ;;  %v6715_v8 = vld [vmem:[#allocation53_spill] sm:$0xff] }
 0x9b7   :  { %4433 = vmatprep.subr.bf16.mxu0 %v4940_v21  ;;  %4472 = vmatpush3.bf16.msra.mxu1 %v6668_v38  ;;  %v6714_v22 = vld [vmem:[#allocation76_spill] sm:$0xff]  ;;  %v6716_v12 = vld [vmem:[#allocation77_spill] sm:$0xff]  ;;  %v6717_v9 = vld [vmem:[#allocation54_spill] sm:$0xff] }
 0x9b8   :  { %4473 = vmatprep.subr.bf16.mxu1 %v4940_v21  ;;  %v6718_v3 = vld [vmem:[#allocation78_spill] sm:$0xff]  ;;  %v6719_v13 = vld [vmem:[#allocation55_spill] sm:$0xff]  ;;  %v6721_v25 = vld [vmem:[#allocation56_spill] sm:$0xff] }
 0x9b9   :  { %v6720_v11 = vld [vmem:[#allocation79_spill] sm:$0xff]  ;;  %v6722_v33 = vld [vmem:[#allocation80_spill] sm:$0xff]  ;;  %v6723_v38 = vld [vmem:[#allocation65_spill] sm:$0xff] }
 0x9ba   :  { %4434 = vmatpush3.bf16.msra.mxu0 %v6669_v39  ;;  %v6724_v39 = vld [vmem:[#allocation66_spill] sm:$0xff] }
 0x9bb   :  { %4435 = vmatprep.subr.bf16.mxu0 %v4940_v21  ;;  %4474 = vmatpush3.bf16.msra.mxu1 %v6670_v16  ;;  %v6725_v16 = vld [vmem:[#allocation67_spill] sm:$0xff] }
 0x9bc   :  { %4475 = vmatprep.subr.bf16.mxu1 %v4940_v21 }
 0x9be   :  { %4436 = vmatpush3.bf16.msra.mxu0 %v6671_v1  ;;  %v6726_v1 = vld [vmem:[#allocation68_spill] sm:$0xff] }
 0x9bf   :  { %4437 = vmatprep.subr.bf16.mxu0 %v4940_v21  ;;  %4476 = vmatpush3.bf16.msra.mxu1 %v6672_v43  ;;  %v6727_v43 = vld [vmem:[#allocation69_spill] sm:$0xff] }
 0x9c0   :  { %4477 = vmatprep.subr.bf16.mxu1 %v4940_v21 }
 0x9c2   :  { %4438 = vmatpush3.bf16.msra.mxu0 %v6673_v44  ;;  %v6729_v44 = vld [vmem:[#allocation71_spill] sm:$0xff] }
 0x9c3   :  { %4443 = vmatprep.subr.bf16.mxu0 %v4940_v21  ;;  %4478 = vmatpush3.bf16.msra.mxu1 %v6674_v0  ;;  %v3623_v0 = vrot.slane %v6337_v20, 7 }
 0x9c4   :  { %4503 = vmatprep.subr.bf16.mxu1 %v4940_v21 }
 0x9c5   :  { %4440 = vmatmul.mubr.bf16.vlgmr.msra.gmra.mrb[56].mxu0 %v3278_v32  ;;  %v6728_v32 = vld [vmem:[#allocation70_spill] sm:$0xff] }
 0x9c6   :  { %4444 = vmatpush3.bf16.msra.mxu0 %v6675_v53  ;;  %4459 = vmatprep.mubr.msk.bf16.mxu0 %vm4941_vm1, %v4940_v21  ;;  %v6731_v53 = vld [vmem:[#allocation81_spill] sm:$0xff] }
 0x9c7   :  { %4445 = vmatprep.subr.bf16.mxu0 %v4940_v21  ;;  %4480 = vmatmul.mubr.bf16.vlgmr.msra.gmra.mrb[40].mxu1 %v3368_v45  ;;  %v6730_v45 = vld [vmem:[#allocation72_spill] sm:$0xff] }
 0x9c8   :  { %4504 = vmatpush3.bf16.msra.mxu1 %v6676_v23  ;;  %4519 = vmatprep.mubr.msk.bf16.mxu1 %vm4941_vm1, %v4940_v21  ;;  %v6732_v23 = vld [vmem:[#allocation82_spill] sm:$0xff] }
 0x9c9   :  { %4505 = vmatprep.subr.bf16.mxu1 %v4940_v21 }
 0x9ca   :  { %4446 = vmatpush3.bf16.msra.mxu0 %v6677_v46  ;;  %v6733_v46 = vld [vmem:[#allocation83_spill] sm:$0xff] }
 0x9cb   :  { %4447 = vmatprep.subr.bf16.mxu0 %v4940_v21 }
 0x9cc   :  { %4506 = vmatpush3.bf16.msra.mxu1 %v6678_v47  ;;  %v6735_v47 = vld [vmem:[#allocation85_spill] sm:$0xff] }
 0x9cd   :  { %4507 = vmatprep.subr.bf16.mxu1 %v4940_v21 }
 0x9ce   :  { %4448 = vmatpush3.bf16.msra.mxu0 %v6679_v14  ;;  %v6736_v14 = vld [vmem:[#allocation86_spill] sm:$0xff] }
 0x9cf   :  { %4449 = vmatprep.subr.bf16.mxu0 %v4940_v21 }
 0x9d0   :  { %4508 = vmatpush3.bf16.msra.mxu1 %v6680_v48  ;;  %v6737_v48 = vld [vmem:[#allocation87_spill] sm:$0xff] }
 0x9d1   :  { %4509 = vmatprep.subr.bf16.mxu1 %v4940_v21 }
 0x9d2   :  { %4450 = vmatpush3.bf16.msra.mxu0 %v6681_v19  ;;  %v3724_v19 = vrot.slane %v6339_v50, 1 }
 0x9d3   :  { %4451 = vmatprep.subr.bf16.mxu0 %v4940_v21 }
 0x9d4   :  { %4510 = vmatpush3.bf16.msra.mxu1 %v6682_v15  ;;  %v6738_v15 = vld [vmem:[#allocation88_spill] sm:$0xff] }
 0x9d5   :  { %4511 = vmatprep.subr.bf16.mxu1 %v4940_v21 }
 0x9d6   :  { %4452 = vmatpush3.bf16.msra.mxu0 %v6683_v51 }
 0x9d7   :  { %4453 = vmatprep.subr.bf16.mxu0 %v4940_v21 }
 0x9d8   :  { %4512 = vmatpush3.bf16.msra.mxu1 %v6684_v4 }
 0x9d9   :  { %4513 = vmatprep.subr.bf16.mxu1 %v4940_v21 }
 0x9da   :  { %4454 = vmatpush3.bf16.msra.mxu0 %v6685_v54 }
 0x9db   :  { %4455 = vmatprep.subr.bf16.mxu0 %v4940_v21 }
 0x9dc   :  { %4514 = vmatpush3.bf16.msra.mxu1 %v6686_v56 }
 0x9dd   :  { %4515 = vmatprep.subr.bf16.mxu1 %v4940_v21 }
 0x9de   :  { %4456 = vmatpush3.bf16.msra.mxu0 %v6687_v55 }
 0x9df   :  { %4457 = vmatprep.subr.bf16.mxu0 %v4940_v21 }
 0x9e0   :  { %4516 = vmatpush3.bf16.msra.mxu1 %v6688_v57 }
 0x9e1   :  { %4517 = vmatprep.subr.bf16.mxu1 %v4940_v21 }
 0x9e2   :  { %4458 = vmatpush3.bf16.msra.mxu0 %v6689_v58 }
 0x9e3   :  { %4483 = vmatprep.subr.bf16.mxu0 %v4940_v21 }
 0x9e4   :  { %4518 = vmatpush3.bf16.msra.mxu1 %v6690_v63 }
 0x9e5   :  { %4460 = vmatmul.mubr.bf16.vlgmr.msra.gmra.mrb[60].mxu0 %v6337_v20  ;;  %4543 = vmatprep.subr.bf16.mxu1 %v4940_v21  ;;  %v6734_v20 = vld [vmem:[#allocation84_spill] sm:$0xff] }
 0x9e6   :  { %4484 = vmatpush3.bf16.msra.mxu0 %v6691_v5  ;;  %4499 = vmatprep.mubr.msk.bf16.mxu0 %vm4941_vm1, %v4940_v21 }
 0x9e7   :  { %4485 = vmatprep.subr.bf16.mxu0 %v4940_v21  ;;  %4520 = vmatmul.mubr.bf16.vlgmr.msra.gmra.mrb[44].mxu1 %v3470_v59 }
 0x9e8   :  { %4544 = vmatpush3.bf16.msra.mxu1 %v6692_v36  ;;  %4559 = vmatprep.mubr.msk.bf16.mxu1 %vm4941_vm1, %v4940_v21 }
 0x9e9   :  { %4545 = vmatprep.subr.bf16.mxu1 %v4940_v21 }
 0x9ea   :  { %4486 = vmatpush3.bf16.msra.mxu0 %v6693_v62 }
 0x9eb   :  { %4487 = vmatprep.subr.bf16.mxu0 %v4940_v21 }
 0x9ec   :  { %4546 = vmatpush3.bf16.msra.mxu1 %v6694_v34 }
 0x9ed   :  { %4547 = vmatprep.subr.bf16.mxu1 %v4940_v21 }
 0x9ee   :  { %4488 = vmatpush3.bf16.msra.mxu0 %v6695_v60 }
 0x9ef   :  { %4489 = vmatprep.subr.bf16.mxu0 %v4940_v21 }
 0x9f0   :  { %4548 = vmatpush3.bf16.msra.mxu1 %v6696_v41 }
 0x9f1   :  { %4549 = vmatprep.subr.bf16.mxu1 %v4940_v21 }
 0x9f2   :  { %4490 = vmatpush3.bf16.msra.mxu0 %v6697_v40 }
 0x9f3   :  { %4491 = vmatprep.subr.bf16.mxu0 %v4940_v21 }
 0x9f4   :  { %4550 = vmatpush3.bf16.msra.mxu1 %v6698_v37 }
 0x9f5   :  { %4551 = vmatprep.subr.bf16.mxu1 %v4940_v21 }
 0x9f6   :  { %4492 = vmatpush3.bf16.msra.mxu0 %v6699_v61 }
 0x9f7   :  { %4493 = vmatprep.subr.bf16.mxu0 %v4940_v21 }
 0x9f8   :  { %4552 = vmatpush3.bf16.msra.mxu1 %v6700_v42 }
 0x9f9   :  { %4553 = vmatprep.subr.bf16.mxu1 %v4940_v21 }
 0x9fa   :  { %4494 = vmatpush3.bf16.msra.mxu0 %v6701_v26 }
 0x9fb   :  { %4495 = vmatprep.subr.bf16.mxu0 %v4940_v21 }
 0x9fc   :  { %4554 = vmatpush3.bf16.msra.mxu1 %v6702_v31 }
 0x9fd   :  { %4555 = vmatprep.subr.bf16.mxu1 %v4940_v21 }
 0x9fe   :  { %4496 = vmatpush3.bf16.msra.mxu0 %v6703_v28 }
 0x9ff   :  { %4497 = vmatprep.subr.bf16.mxu0 %v4940_v21 }
 0xa00   :  { %4556 = vmatpush3.bf16.msra.mxu1 %v6704_v52 }
 0xa01   :  { %4557 = vmatprep.subr.bf16.mxu1 %v4940_v21 }
 0xa02   :  { %4498 = vmatpush3.bf16.msra.mxu0 %v6705_v29 }
 0xa03   :  { %4523 = vmatprep.subr.bf16.mxu0 %v4940_v21 }
 0xa04   :  { %4558 = vmatpush3.bf16.msra.mxu1 %v6706_v30 }
 0xa05   :  { %4500 = vmatmul.mubr.bf16.vlgmr.msra.gmra.mrb[64].mxu0 %v3419_v49  ;;  %4583 = vmatprep.subr.bf16.mxu1 %v4940_v21 }
 0xa06   :  { %4524 = vmatpush3.bf16.msra.mxu0 %v6707_v7  ;;  %4539 = vmatprep.mubr.msk.bf16.mxu0 %vm4941_vm1, %v4940_v21 }
 0xa07   :  { %4525 = vmatprep.subr.bf16.mxu0 %v4940_v21  ;;  %4560 = vmatmul.mubr.bf16.vlgmr.msra.gmra.mrb[48].mxu1 %v3572_v27 }
 0xa08   :  { %4584 = vmatpush3.bf16.msra.mxu1 %v6708_v35  ;;  %4599 = vmatprep.mubr.msk.bf16.mxu1 %vm4941_vm1, %v4940_v21 }
 0xa09   :  { %4585 = vmatprep.subr.bf16.mxu1 %v4940_v21 }
 0xa0a   :  { %4526 = vmatpush3.bf16.msra.mxu0 %v6709_v6 }
 0xa0b   :  { %4527 = vmatprep.subr.bf16.mxu0 %v4940_v21 }
 0xa0c   :  { %4586 = vmatpush3.bf16.msra.mxu1 %v6710_v17 }
 0xa0d   :  { %4587 = vmatprep.subr.bf16.mxu1 %v4940_v21 }
 0xa0e   :  { %4528 = vmatpush3.bf16.msra.mxu0 %v6711_v2 }
 0xa0f   :  { %4529 = vmatprep.subr.bf16.mxu0 %v4940_v21 }
 0xa10   :  { %4588 = vmatpush3.bf16.msra.mxu1 %v6712_v18 }
 0xa11   :  { %4589 = vmatprep.subr.bf16.mxu1 %v4940_v21 }
 0xa12   :  { %4530 = vmatpush3.bf16.msra.mxu0 %v6713_v10 }
 0xa13   :  { %4531 = vmatprep.subr.bf16.mxu0 %v4940_v21 }
 0xa14   :  { %4590 = vmatpush3.bf16.msra.mxu1 %v6714_v22 }
 0xa15   :  { %4591 = vmatprep.subr.bf16.mxu1 %v4940_v21 }
 0xa16   :  { %4532 = vmatpush3.bf16.msra.mxu0 %v6715_v8 }
 0xa17   :  { %4533 = vmatprep.subr.bf16.mxu0 %v4940_v21 }
 0xa18   :  { %4592 = vmatpush3.bf16.msra.mxu1 %v6716_v12 }
 0xa19   :  { %4593 = vmatprep.subr.bf16.mxu1 %v4940_v21 }
 0xa1a   :  { %4534 = vmatpush3.bf16.msra.mxu0 %v6717_v9 }
 0xa1b   :  { %4535 = vmatprep.subr.bf16.mxu0 %v4940_v21 }
 0xa1c   :  { %4594 = vmatpush3.bf16.msra.mxu1 %v6718_v3 }
 0xa1d   :  { %4595 = vmatprep.subr.bf16.mxu1 %v4940_v21 }
 0xa1e   :  { %4536 = vmatpush3.bf16.msra.mxu0 %v6719_v13 }
 0xa1f   :  { %4537 = vmatprep.subr.bf16.mxu0 %v4940_v21 }
 0xa20   :  { %4596 = vmatpush3.bf16.msra.mxu1 %v6720_v11 }
 0xa21   :  { %4597 = vmatprep.subr.bf16.mxu1 %v4940_v21 }
 0xa22   :  { %4538 = vmatpush3.bf16.msra.mxu0 %v6721_v25 }
 0xa23   :  { %4563 = vmatprep.subr.bf16.mxu0 %v4940_v21 }
 0xa24   :  { %4598 = vmatpush3.bf16.msra.mxu1 %v6722_v33  ;;  %v3967_v33 = vld [vmem:[%s6559_s13] ss:$0 sm:$0xff] }
 0xa25   :  { %4540 = vmatmul.mubr.bf16.vlgmr.msra.gmra.mrb[68].mxu0 %v3521_v24 }
 0xa26   :  { %4564 = vmatpush3.bf16.msra.mxu0 %v6723_v38  ;;  %4579 = vmatprep.mubr.msk.bf16.mxu0 %vm4941_vm1, %v4940_v21 }
 0xa27   :  { %4565 = vmatprep.subr.bf16.mxu0 %v4940_v21  ;;  %4600 = vmatmul.mubr.bf16.vlgmr.msra.gmra.mrb[52].mxu1 %v6339_v50 }
 0xa2a   :  { %4566 = vmatpush3.bf16.msra.mxu0 %v6724_v39 }
 0xa2b   :  { %4567 = vmatprep.subr.bf16.mxu0 %v4940_v21 }
 0xa2e   :  { %4568 = vmatpush3.bf16.msra.mxu0 %v6725_v16 }
 0xa2f   :  { %4569 = vmatprep.subr.bf16.mxu0 %v4940_v21 }
 0xa32   :  { %4570 = vmatpush3.bf16.msra.mxu0 %v6726_v1 }
 0xa33   :  { %4571 = vmatprep.subr.bf16.mxu0 %v4940_v21 }
 0xa36   :  { %4572 = vmatpush3.bf16.msra.mxu0 %v6727_v43 }
 0xa37   :  { %4573 = vmatprep.subr.bf16.mxu0 %v4940_v21 }
 0xa3a   :  { %4574 = vmatpush3.bf16.msra.mxu0 %v6728_v32 }
 0xa3b   :  { %4575 = vmatprep.subr.bf16.mxu0 %v4940_v21 }
 0xa3e   :  { %4576 = vmatpush3.bf16.msra.mxu0 %v6729_v44 }
 0xa3f   :  { %4577 = vmatprep.subr.bf16.mxu0 %v4940_v21 }
 0xa42   :  { %4578 = vmatpush3.bf16.msra.mxu0 %v6730_v45 }
 0xa43   :  { %4603 = vmatprep.subr.bf16.mxu0 %v4940_v21 }
 0xa45   :  { %4580 = vmatmul.mubr.bf16.vlgmr.msra.gmra.mrb[72].mxu0 %v3623_v0 }
 0xa46   :  { %4604 = vmatpush3.bf16.msra.mxu0 %v6731_v53  ;;  %4619 = vmatprep.mubr.msk.bf16.mxu0 %vm4941_vm1, %v4940_v21 }
 0xa47   :  { %4605 = vmatprep.subr.bf16.mxu0 %v4940_v21 }
 0xa4a   :  { %4606 = vmatpush3.bf16.msra.mxu0 %v6732_v23 }
 0xa4b   :  { %4607 = vmatprep.subr.bf16.mxu0 %v4940_v21 }
 0xa4e   :  { %4608 = vmatpush3.bf16.msra.mxu0 %v6733_v46 }
 0xa4f   :  { %4609 = vmatprep.subr.bf16.mxu0 %v4940_v21 }
 0xa52   :  { %4610 = vmatpush3.bf16.msra.mxu0 %v6734_v20 }
 0xa53   :  { %4611 = vmatprep.subr.bf16.mxu0 %v4940_v21 }
 0xa56   :  { %4612 = vmatpush3.bf16.msra.mxu0 %v6735_v47 }
 0xa57   :  { %4613 = vmatprep.subr.bf16.mxu0 %v4940_v21 }
 0xa5a   :  { %4614 = vmatpush3.bf16.msra.mxu0 %v6736_v14 }
 0xa5b   :  { %4615 = vmatprep.subr.bf16.mxu0 %v4940_v21 }
 0xa5e   :  { %4616 = vmatpush3.bf16.msra.mxu0 %v6737_v48 }
 0xa5f   :  { %4617 = vmatprep.subr.bf16.mxu0 %v4940_v21 }
 0xa62   :  { %4618 = vmatpush3.bf16.msra.mxu0 %v6738_v15 }
 0xa65   :  { %4620 = vmatmul.mubr.bf16.vlgmr.msra.gmra.mrb[76].mxu0 %v3724_v19 }
 0xa98   :  { %v3314_v51 = vpop.f32.mrb[56].mxu0 }
 0xa99   :  { %v4441_v4 = vpop.f32.mrb[57].mxu0 }
 0xa9a   :  { %v3317_v54 = vpop.f32.mrb[58].mxu0  ;;  %v3404_v56 = vpop.f32.mrb[40].mxu1 }
 0xa9b   :  { %v4442_v55 = vpop.f32.mrb[59].mxu0  ;;  %v4481_v57 = vpop.f32.mrb[41].mxu1 }
 0xa9c   :  { %v3407_v58 = vpop.f32.mrb[42].mxu1 }
 0xa9d   :  { %v4482_v59 = vpop.f32.mrb[43].mxu1 }
 0xab8   :  { %v3354_v63 = vpop.f32.mrb[60].mxu0 }
 0xab9   :  { %v3355_v5 = vadd.f32 %v3354_v63, %v3314_v51  ;;  %v4461_v36 = vpop.f32.mrb[61].mxu0 }
 0xaba   :  { %v3357_v62 = vpop.f32.mrb[62].mxu0  ;;  %v3506_v34 = vpop.f32.mrb[44].mxu1 }
 0xabb   :  { %v3410_v60 = vadd.f32 %v3404_v56, %v3355_v5  ;;  %v4462_v21 = vpop.f32.mrb[63].mxu0  ;;  %v4521_v41 = vpop.f32.mrb[45].mxu1 }
 0xabc   :  { %v3509_v50 = vpop.f32.mrb[46].mxu1 }
 0xabd   :  { %v4522_v40 = vpop.f32.mrb[47].mxu1 }
 0xad8   :  { %v3455_v37 = vpop.f32.mrb[64].mxu0 }
 0xad9   :  { %v3461_v61 = vadd.f32 %v3455_v37, %v3410_v60  ;;  %v4501_v42 = vpop.f32.mrb[65].mxu0 }
 0xada   :  { %v3458_v26 = vpop.f32.mrb[66].mxu0  ;;  %v3608_v31 = vpop.f32.mrb[48].mxu1 }
 0xadb   :  { %v3512_v28 = vadd.f32 %v3506_v34, %v3461_v61  ;;  %v4502_v52 = vpop.f32.mrb[67].mxu0  ;;  %v4561_v49 = vpop.f32.mrb[49].mxu1 }
 0xadc   :  { %v3611_v29 = vpop.f32.mrb[50].mxu1 }
 0xadd   :  { %v4562_v27 = vpop.f32.mrb[51].mxu1 }
 0xaf8   :  { %v3557_v30 = vpop.f32.mrb[68].mxu0 }
 0xaf9   :  { %v3563_v7 = vadd.f32 %v3557_v30, %v3512_v28  ;;  %v4541_v35 = vpop.f32.mrb[69].mxu0 }
 0xafa   :  { %v3560_v6 = vpop.f32.mrb[70].mxu0  ;;  %v3708_v17 = vpop.f32.mrb[52].mxu1 }
 0xafb   :  { %v3614_v2 = vadd.f32 %v3608_v31, %v3563_v7  ;;  %v4542_v18 = vpop.f32.mrb[71].mxu0  ;;  %v4601_v10 = vpop.f32.mrb[53].mxu1 }
 0xafc   :  { %v3711_v22 = vpop.f32.mrb[54].mxu1 }
 0xafd   :  { %v4602_v8 = vpop.f32.mrb[55].mxu1 }
 0xb18   :  { %v3659_v12 = vpop.f32.mrb[72].mxu0 }
 0xb19   :  { %v3665_v9 = vadd.f32 %v3659_v12, %v3614_v2  ;;  %v4581_v3 = vpop.f32.mrb[73].mxu0 }
 0xb1a   :  { %v3662_v13 = vpop.f32.mrb[74].mxu0 }
 0xb1b   :  { %v3714_v11 = vadd.f32 %v3708_v17, %v3665_v9  ;;  %v4582_v24 = vpop.f32.mrb[75].mxu0 }
 0xb38   :  { %v3760_v25 = vpop.f32.mrb[76].mxu0 }
 0xb39   :  { %v3766_v38 = vadd.f32 %v3760_v25, %v3714_v11  ;;  %v4621_v39 = vpop.f32.mrb[77].mxu0 }
 0xb3a   :  { %v3763_v16 = vpop.f32.mrb[78].mxu0 }
 0xb3b   :  { %v3774_v1 = vadd.f32 %v3967_v33, %v3766_v38  ;;  %v4622_v43 = vpop.f32.mrb[79].mxu0 }
 0xb3d   :  { %3775 = vst [vmem:[#allocation4] sm:$0x3] %v3774_v1 }
 0xb3e   :  { %4924 = shalt.err (!%p4921_p4)
}
 0xb3f   :  { %s4925_s13 = scalar_lea.hbm %s6560_s14, 32 }
 0xb40   :  { %p4926_p5 = scmp.ne.s32.totalorder %s6560_s14, %s4925_s13  ;;  %p4929_p6 = scmp.lt.u32.totalorder %s4925_s13, %s6560_s14 }
 0xb42   :  { %p4931_p7 = pnand %p4929_p6, %p4926_p5 }
 0xb44   :  { %4934 = shalt.err (!%p4931_p7)
}
 0xb45   :  { %3785 = dma.vmem_to_hbm [thread:$0]  %s3783_s20, 32, %s6560_s14, [#allocation5]  }
 0xb46   :  { %4937 = dma.done.wait [#allocation5], 32  }
 0xb47   :  { %4938 = vsyncadd [#allocation5], 4294967264 }
 0xb48   :  { %3789 = vsyncpa [#allocation5], 1 }
 0xb49   :  { %3790 = vsyncmov [#allocation3] }
 0xb4c   :  { %s3791_s29 = vpop.sfrf %3790 }
 0xb4d   :  { %p3968_p8 = scmp.ne.s32.totalorder %s3791_s29, 0 }
 0xb4f   :  { %3795 = shalt.err (%p3968_p8)  }

</bundles_post_ra>
